<compile_context>
chip_gen: v5e
topology: v5e:2x2
jax: 0.10.0
libtpu: 0.0.40
codegen_flags: <defaults>
</compile_context>

<pallas_src>
import functools
import math

import jax
import jax.numpy as jnp
from jax.experimental import pallas as pl
from jax.experimental.pallas import tpu as pltpu

BN_EPS = 1e-5


# ----------------------------------------------------------------------------
# Single fused Pallas kernel: whole BrainV1 forward (curiosity=False path).
# grid=(9,) streams w3 (one 256-row block per step) while conv3 accumulates.
#
# Packed-bias lane offsets (each segment starts at a multiple of 128):
#   b1(288)@0  b2(256)@384  b3(512)@640  b4(128)@1152  br(128)@1280
#   q1b(64)@1408  d1b(128)@1536  d2b(128)@1664   -> total 1792
# Packed-weight row offsets ([R,128] bf16):
#   w4(512)@0  wr(512)@512  q1w(128)@1024  d1h(128)@1152  d1e(Ep)@1280
#   d2w(128)@1280+Ep
# ----------------------------------------------------------------------------
def _brain_kernel(p1_ref, xe_ref, w1_ref, w2_ref, w3_ref, wpk_ref, b_ref,
                  o_ref, h2_sc, acc3_sc, *, bp, ep):
    f32, bf16 = jnp.float32, jnp.bfloat16
    relu = lambda v: jnp.maximum(v, 0.0)
    k = pl.program_id(0)

    # --- step 0: conv1 (block-diag) + conv2, result parked in VMEM scratch ---
    @pl.when(k == 0)
    def _():
        # conv1 + ReLU evaluated at every (conv2-tap, conv2-position) pair,
        # as one lane-dense matmul via the block-diagonal W1.
        h1 = relu(jnp.dot(p1_ref[...], w1_ref[...], preferred_element_type=f32)
                  + b_ref[:, 0:288])                                  # [9*bp, 288]
        # conv2 + folded BN + ReLU: single K=288 matmul over all 9 taps.
        h2_sc[...] = relu(jnp.dot(h1.astype(bf16), w2_ref[...],
                                  preferred_element_type=f32)
                          + b_ref[:, 384:640])                        # [9*bp, 256]
        acc3_sc[...] = jnp.zeros_like(acc3_sc)

    # --- every step: conv3 partial sum for output position k (w3 streamed) ---
    row0 = pl.multiple_of(k * bp, 8)
    h2_p = h2_sc[pl.ds(row0, bp), :].astype(bf16)                     # [bp, 256]
    acc3_sc[...] += jnp.dot(h2_p, w3_ref[...], preferred_element_type=f32)

    # --- last step: l4 + residual, fused dueling heads, dueling combine ------
    @pl.when(k == pl.num_programs(0) - 1)
    def _():
        h3 = relu(acc3_sc[...] + b_ref[:, 640:1152]).astype(bf16)     # [bp, 512]

        # l4 + folded BN + ReLU
        main = relu(jnp.dot(h3, wpk_ref[0:512, :],
                            preferred_element_type=f32) + b_ref[:, 1152:1280])
        # residual linear + folded BN + ReLU (xflat sits in lanes 0:400 of xe,
        # lanes 400:512 of xe and rows 400:512 of wr are zero-padded).
        res = relu(jnp.dot(xe_ref[:, 0:512], wpk_ref[512:1024, :],
                           preferred_element_type=f32) + b_ref[:, 1280:1408])
        vis = (main + res).astype(bf16)                               # [bp, 128]

        # QValue l1 (lane-padded to 128; lanes 64: carry zero weights/bias).
        h = relu(jnp.dot(vis, wpk_ref[1024:1152, :],
                         preferred_element_type=f32)
                 + b_ref[:, 1408:1536]).astype(bf16)                  # [bp, 128]
        ex = xe_ref[:, 512:512 + ep]                                  # [bp, Ep]

        # Fused advantage|state first layer (torch.cat replaced by split
        # weight blocks; advantage head in lanes 0:64, state head in 64:128).
        d1 = relu(jnp.dot(h, wpk_ref[1152:1280, :], preferred_element_type=f32)
                  + jnp.dot(ex, wpk_ref[1280:1280 + ep, :],
                            preferred_element_type=f32)
                  + b_ref[:, 1536:1664]).astype(bf16)                 # [bp, 128]

        # Fused block-diagonal second layer: lanes 0:4 = advantage, lane 4 = V.
        head = (jnp.dot(d1, wpk_ref[1280 + ep:1408 + ep, :],
                        preferred_element_type=f32) + b_ref[:, 1664:1792])
        adv = head[:, 0:4]
        sv = head[:, 4:5]
        # dueling: V + (A - A.mean(dim=1, keepdim=True))
        o_ref[...] = sv + (adv - jnp.mean(adv, axis=1, keepdims=True))


# ----------------------------------------------------------------------------
# Plain-JAX glue on the RAW input only (tiny; activations never touch HBM).
# ----------------------------------------------------------------------------
def _conv_patch_rows_wide(state_nchw, bp):
    """im2col of the raw input for the fused conv1->conv2 evaluation.

    Returns [9*bp, 324], row = pos*bp + b, lanes [t*36:(t+1)*36] = the 3x3x4
    input window (kh, kw, cin) whose conv1 output lands at spatial location
    (2*oh + i, 2*ow + j), with pos = oh*3+ow the conv2/conv3 output position
    and t = i*3+j the conv2 kernel tap.
    """
    b = state_nchw.shape[0]
    xn = jnp.transpose(state_nchw, (0, 2, 3, 1))              # [B, 10, 10, 4]
    if bp > b:
        xn = jnp.pad(xn, ((0, bp - b), (0, 0), (0, 0), (0, 0)))
    pos_rows = []
    for oh in range(3):
        for ow in range(3):
            taps = []
            for i in range(3):
                for j in range(3):
                    r0, c0 = 2 * oh + i, 2 * ow + j
                    win = xn[:, r0:r0 + 3, c0:c0 + 3, :]      # [bp, 3, 3, 4]
                    taps.append(win.reshape(bp, 36))
            pos_rows.append(jnp.concatenate(taps, axis=1))    # [bp, 324]
    return jnp.concatenate(pos_rows, axis=0)                  # [9*bp, 324]


@jax.jit
def brain_forward(state, extra, params):
    """state: [B, 4, 10, 10] NCHW f32, extra: [B, E] f32 -> [B, 4] f32."""
    B = state.shape[0]
    E = extra.shape[1]
    Ep = -(-E // 8) * 8
    Bp = max(8, -(-B // 8) * 8)        # pad rows to the 8-sublane granule

    p1 = _conv_patch_rows_wide(state, Bp).astype(jnp.bfloat16)   # [9*Bp, 324]
    # xe: torch.flatten(input, 1) in lanes 0:400 (padded to a 128-aligned 512),
    # `extra` in lanes 512:512+E (padded to Ep).
    xflat = state.reshape(B, 400)
    xe = jnp.zeros((Bp, 512 + Ep), jnp.float32)
    xe = xe.at[:B, 0:400].set(xflat).at[:B, 512:512 + E].set(extra)
    xe = xe.astype(jnp.bfloat16)

    args = (p1, xe, params["w1bd"], params["w2"], params["w3"],
            params["wpack"], params["bias"])

    def full(a):                        # whole array, resident across the grid
        return pl.BlockSpec(a.shape, lambda k: (0,) * a.ndim)

    in_specs = [full(p1), full(xe), full(params["w1bd"]), full(params["w2"]),
                pl.BlockSpec((256, 512), lambda k: (k, 0)),   # stream w3
                full(params["wpack"]), full(params["bias"])]

    out = pl.pallas_call(
        functools.partial(_brain_kernel, bp=Bp, ep=Ep),
        out_shape=jax.ShapeDtypeStruct((Bp, 4), jnp.float32),
        grid=(9,),
        in_specs=in_specs,
        out_specs=pl.BlockSpec((Bp, 4), lambda k: (0, 0)),
        scratch_shapes=[pltpu.VMEM((9 * Bp, 256), jnp.float32),   # h2
                        pltpu.VMEM((Bp, 512), jnp.float32)],      # conv3 acc
        compiler_params=pltpu.CompilerParams(
            dimension_semantics=("arbitrary",),
            vmem_limit_bytes=32 * 1024 * 1024),
    )(*args)
    return out[:B]


# ----------------------------------------------------------------------------
# Parameter construction: deterministic PyTorch-like uniform init, BN folded
# with init-time eval stats, then packed into 5 arrays (block-diag conv1,
# conv2, conv3, a 128-lane weight pack, and a single bias pack).
# ----------------------------------------------------------------------------
def _uniform(key, shape, fan_in):
    bound = 1.0 / math.sqrt(fan_in)
    return jax.random.uniform(key, shape, jnp.float32, -bound, bound)


def make_params(key, extra_dim):
    assert extra_dim >= 18, "advantage weight surgery requires extra dim >= 18"
    E = extra_dim
    Ep = -(-E // 8) * 8
    mid = 64
    ks = iter(jax.random.split(key, 32))
    scale = 1.0 / math.sqrt(1.0 + BN_EPS)   # eval-mode BN fold, init-time stats

    def lin(k_in, n_out, fan_in, bn):
        w = _uniform(next(ks), (k_in, n_out), fan_in)
        b = _uniform(next(ks), (n_out,), fan_in)
        if bn:
            w, b = w * scale, b * scale     # + shift (= 0)
        return w, b

    # VisualCortex (conv weights in im2col [K, N] layout)
    w1, b1 = lin(36, 32, 4 * 9, bn=False)            # conv1
    w2, b2 = lin(288, 256, 32 * 9, bn=True)          # conv2 (rows tap-major, cin)
    w3, b3 = lin(2304, 512, 256 * 9, bn=True)        # conv3 (rows pos-major, cin)
    w4, b4 = lin(512, 128, 512, bn=True)             # l4
    wr, br = lin(400, 128, 400, bn=True)             # residual

    # QValueModule
    q1w, q1b = lin(128, mid, 128, bn=False)

    # advantage_l[0]: PyTorch [out, in] layout, weight surgery, BN fold, transpose.
    a1 = _uniform(next(ks), (mid, mid + E), mid + E)
    for i in range(4):
        a1 = a1.at[:, -3 - i * 4].set(-0.1)
        a1 = a1.at[:, -1 - i * 4].set(0.1)
    for i in range(4):
        a1 = a1.at[i, -17].set(0.01 if i in (2, 3) else -0.01)
        a1 = a1.at[i, -18].set(0.01 if i in (0, 1) else -0.01)
    a1b = _uniform(next(ks), (mid,), mid + E) * scale
    a1t = (a1 * scale).T                              # [64+E, 64]

    a2w, a2b = lin(mid, 4, mid, bn=False)

    s1 = _uniform(next(ks), (mid + E, mid), mid + E) * scale   # [64+E, 64]
    s1b = _uniform(next(ks), (mid,), mid + E) * scale
    s2w, s2b = lin(mid, 1, mid, bn=False)

    # --- packing --------------------------------------------------------------
    bf16 = jnp.bfloat16

    # conv1 as one block-diagonal matmul [324, 288]; block (t, t) = w1.
    w1bd = jnp.zeros((324, 288), jnp.float32)
    for t in range(9):
        w1bd = w1bd.at[t * 36:(t + 1) * 36, t * 32:(t + 1) * 32].set(w1)
    b1w = jnp.tile(b1, 9)                                       # [288]

    # fused dueling first layer: lanes 0:64 = advantage head, 64:128 = state head
    d1h = jnp.concatenate([a1t[:mid], s1[:mid]], axis=1)        # [64, 128]
    d1e = jnp.concatenate([a1t[mid:], s1[mid:]], axis=1)        # [E, 128]
    d1b = jnp.concatenate([a1b, s1b])                           # [128]

    # fused dueling second layer (block diagonal): cols 0:4 = adv, col 4 = value
    d2w = jnp.zeros((128, 128), jnp.float32)
    d2w = d2w.at[0:mid, 0:4].set(a2w).at[mid:128, 4:5].set(s2w)
    d2b = jnp.zeros((128,), jnp.float32).at[0:4].set(a2b).at[4:5].set(s2b)

    # 128-lane weight pack (row segments at 8-aligned offsets)
    wr_p = jnp.zeros((512, 128), jnp.float32).at[0:400, :].set(wr)
    q1w_p = jnp.zeros((128, 128), jnp.float32).at[:, 0:mid].set(q1w)
    d1h_p = jnp.zeros((128, 128), jnp.float32).at[0:mid, :].set(d1h)
    d1e_p = jnp.zeros((Ep, 128), jnp.float32).at[0:E, :].set(d1e)
    wpack = jnp.concatenate([w4, wr_p, q1w_p, d1h_p, d1e_p, d2w], axis=0)

    # bias pack: every segment starts at a 128-aligned lane offset
    def seg(v, width):
        return jnp.zeros((width,), jnp.float32).at[:v.shape[0]].set(v)
    bias = jnp.concatenate([
        seg(b1w, 384), seg(b2, 256), seg(b3, 512), seg(b4, 128), seg(br, 128),
        seg(q1b, 128), seg(d1b, 128), seg(d2b, 128)]).reshape(1, -1)  # [1, 1792]

    return {
        "w1bd": w1bd.astype(bf16),      # [324, 288]
        "w2": w2.astype(bf16),          # [288, 256]
        "w3": w3.astype(bf16),          # [2304, 512]
        "wpack": wpack.astype(bf16),    # [1408+Ep, 128]
        "bias": bias,                   # [1, 1792] f32
    }


# ----------------------------------------------------------------------------
if __name__ == "__main__":
    key = jax.random.PRNGKey(0)
    k_params, k_state, k_extra = jax.random.split(key, 3)

    B, E = 2, 20   # extra feature dim must be >= 18 (advantage weight surgery)
    params = make_params(k_params, E)
    state = jax.random.normal(k_state, (B, 4, 10, 10), jnp.float32)
    extra = jax.random.normal(k_extra, (B, E), jnp.float32)

    out = brain_forward(state, extra, params)
    out = jax.block_until_ready(out)
    assert out.shape == (B, 4) and out.dtype == jnp.float32
    assert bool(jnp.all(jnp.isfinite(out)))
    print("KERNEL_OK")
</pallas_src>

<mosaic_0001>
module attributes {stable_mosaic.version = 11 : i64} {
  func.func @_brain_kernel(%arg0: i32, %arg1: memref<72x324xbf16, #tpu.memory_space<vmem>>, %arg2: memref<8x536xbf16, #tpu.memory_space<vmem>>, %arg3: memref<324x288xbf16, #tpu.memory_space<vmem>>, %arg4: memref<288x256xbf16, #tpu.memory_space<vmem>>, %arg5: memref<256x512xbf16, #tpu.memory_space<vmem>>, %arg6: memref<1432x128xbf16, #tpu.memory_space<vmem>>, %arg7: memref<1x1792xf32, #tpu.memory_space<vmem>>, %arg8: memref<8x4xf32, #tpu.memory_space<vmem>>, %arg9: memref<72x256xf32, #tpu.memory_space<vmem>>, %arg10: memref<8x512xf32, #tpu.memory_space<vmem>>) attributes {dimension_semantics = [#tpu.dimension_semantics<arbitrary>], iteration_bounds = array<i64: 9>, scalar_prefetch = 0 : i64, scratch_operands = 2 : i64, tpu.core_type = #tpu.core_type<tc>, window_params = [{pipeline_mode = #tpu.pipeline_mode<synchronous>, transform_indices = @transform_0, window_bounds = array<i64: 72, 324>}, {pipeline_mode = #tpu.pipeline_mode<synchronous>, transform_indices = @transform_1, window_bounds = array<i64: 8, 536>}, {pipeline_mode = #tpu.pipeline_mode<synchronous>, transform_indices = @transform_2, window_bounds = array<i64: 324, 288>}, {pipeline_mode = #tpu.pipeline_mode<synchronous>, transform_indices = @transform_3, window_bounds = array<i64: 288, 256>}, {transform_indices = @transform_4, window_bounds = array<i64: 256, 512>}, {pipeline_mode = #tpu.pipeline_mode<synchronous>, transform_indices = @transform_5, window_bounds = array<i64: 1432, 128>}, {pipeline_mode = #tpu.pipeline_mode<synchronous>, transform_indices = @transform_6, window_bounds = array<i64: 1, 1792>}, {pipeline_mode = #tpu.pipeline_mode<synchronous>, transform_indices = @transform_7, window_bounds = array<i64: 8, 4>}]} {
    %c0_i32 = arith.constant 0 : i32
    %0 = arith.cmpi eq, %arg0, %c0_i32 : i32
    %1 = arith.extui %0 : i1 to i32
    %c0_i32_0 = arith.constant 0 : i32
    %2 = arith.cmpi ne, %1, %c0_i32_0 : i32
    scf.if %2 {
      %c0_9 = arith.constant 0 : index
      %c0_10 = arith.constant 0 : index
      %16 = vector.load %arg1[%c0_9, %c0_10] : memref<72x324xbf16, #tpu.memory_space<vmem>>, vector<72x324xbf16>
      %c0_11 = arith.constant 0 : index
      %c0_12 = arith.constant 0 : index
      %17 = vector.load %arg3[%c0_11, %c0_12] : memref<324x288xbf16, #tpu.memory_space<vmem>>, vector<324x288xbf16>
      %cst_13 = arith.constant dense<0.000000e+00> : vector<72x288xf32>
      %18 = tpu.matmul %16, %17, %cst_13 {dimension_numbers = #tpu.dot_dimension_numbers<[1], [0], [0], [1], [0, 0, 1, 1], [], []>} : vector<72x324xbf16>, vector<324x288xbf16>, vector<72x288xf32> -> vector<72x288xf32>
      %c0_14 = arith.constant 0 : index
      %c0_15 = arith.constant 0 : index
      %19 = vector.load %arg7[%c0_14, %c0_15] : memref<1x1792xf32, #tpu.memory_space<vmem>>, vector<1x288xf32>
      %20 = vector.broadcast %19 : vector<1x288xf32> to vector<72x288xf32>
      %21 = arith.addf %18, %20 : vector<72x288xf32>
      %cst_16 = arith.constant 0.000000e+00 : f32
      %22 = vector.broadcast %cst_16 : f32 to vector<72x288xf32>
      %23 = arith.maximumf %21, %22 : vector<72x288xf32>
      %24 = arith.truncf %23 : vector<72x288xf32> to vector<72x288xbf16>
      %c0_17 = arith.constant 0 : index
      %c0_18 = arith.constant 0 : index
      %25 = vector.load %arg4[%c0_17, %c0_18] : memref<288x256xbf16, #tpu.memory_space<vmem>>, vector<288x256xbf16>
      %cst_19 = arith.constant dense<0.000000e+00> : vector<72x256xf32>
      %26 = tpu.matmul %24, %25, %cst_19 {dimension_numbers = #tpu.dot_dimension_numbers<[1], [0], [0], [1], [0, 0, 1, 1], [], []>} : vector<72x288xbf16>, vector<288x256xbf16>, vector<72x256xf32> -> vector<72x256xf32>
      %c0_20 = arith.constant 0 : index
      %c384 = arith.constant 384 : index
      %27 = vector.load %arg7[%c0_20, %c384] : memref<1x1792xf32, #tpu.memory_space<vmem>>, vector<1x256xf32>
      %28 = vector.broadcast %27 : vector<1x256xf32> to vector<72x256xf32>
      %29 = arith.addf %26, %28 : vector<72x256xf32>
      %cst_21 = arith.constant 0.000000e+00 : f32
      %30 = vector.broadcast %cst_21 : f32 to vector<72x256xf32>
      %31 = arith.maximumf %29, %30 : vector<72x256xf32>
      %c0_22 = arith.constant 0 : index
      %c0_23 = arith.constant 0 : index
      %32 = vector.load %arg9[%c0_22, %c0_23] : memref<72x256xf32, #tpu.memory_space<vmem>>, vector<72x256xf32>
      tpu.vector_store %arg9[%c0_22, %c0_23], %31 {strides = array<i32>} : memref<72x256xf32, #tpu.memory_space<vmem>>, vector<72x256xf32>,
      %cst_24 = arith.constant 0.000000e+00 : f32
      %33 = vector.broadcast %cst_24 : f32 to vector<8x512xf32>
      %c0_25 = arith.constant 0 : index
      %c0_26 = arith.constant 0 : index
      %34 = vector.load %arg10[%c0_25, %c0_26] : memref<8x512xf32, #tpu.memory_space<vmem>>, vector<8x512xf32>
      tpu.vector_store %arg10[%c0_25, %c0_26], %33 {strides = array<i32>} : memref<8x512xf32, #tpu.memory_space<vmem>>, vector<8x512xf32>,
    } else {
    }
    %c8_i32 = arith.constant 8 : i32
    %3 = arith.muli %arg0, %c8_i32 : i32
    %4 = tpu.assume_multiple %3, 8 : i32
    %5 = arith.index_cast %4 : i32 to index
    %c0 = arith.constant 0 : index
    %6 = vector.load %arg9[%5, %c0] : memref<72x256xf32, #tpu.memory_space<vmem>>, vector<8x256xf32>
    %7 = arith.truncf %6 : vector<8x256xf32> to vector<8x256xbf16>
    %c0_1 = arith.constant 0 : index
    %c0_2 = arith.constant 0 : index
    %8 = vector.load %arg10[%c0_1, %c0_2] : memref<8x512xf32, #tpu.memory_space<vmem>>, vector<8x512xf32>
    %c0_3 = arith.constant 0 : index
    %c0_4 = arith.constant 0 : index
    %9 = vector.load %arg5[%c0_3, %c0_4] : memref<256x512xbf16, #tpu.memory_space<vmem>>, vector<256x512xbf16>
    %cst = arith.constant dense<0.000000e+00> : vector<8x512xf32>
    %10 = tpu.matmul %7, %9, %cst {dimension_numbers = #tpu.dot_dimension_numbers<[1], [0], [0], [1], [0, 0, 1, 1], [], []>} : vector<8x256xbf16>, vector<256x512xbf16>, vector<8x512xf32> -> vector<8x512xf32>
    %11 = arith.addf %8, %10 : vector<8x512xf32>
    %c0_5 = arith.constant 0 : index
    %c0_6 = arith.constant 0 : index
    %12 = vector.load %arg10[%c0_5, %c0_6] : memref<8x512xf32, #tpu.memory_space<vmem>>, vector<8x512xf32>
    tpu.vector_store %arg10[%c0_5, %c0_6], %11 {strides = array<i32>} : memref<8x512xf32, #tpu.memory_space<vmem>>, vector<8x512xf32>,
    %c8_i32_7 = arith.constant 8 : i32
    %13 = arith.cmpi eq, %arg0, %c8_i32_7 : i32
    %14 = arith.extui %13 : i1 to i32
    %c0_i32_8 = arith.constant 0 : i32
    %15 = arith.cmpi ne, %14, %c0_i32_8 : i32
    scf.if %15 {
      %c0_9 = arith.constant 0 : index
      %c0_10 = arith.constant 0 : index
      %16 = vector.load %arg10[%c0_9, %c0_10] : memref<8x512xf32, #tpu.memory_space<vmem>>, vector<8x512xf32>
      %c0_11 = arith.constant 0 : index
      %c640 = arith.constant 640 : index
      %17 = vector.load %arg7[%c0_11, %c640] : memref<1x1792xf32, #tpu.memory_space<vmem>>, vector<1x512xf32>
      %18 = vector.broadcast %17 : vector<1x512xf32> to vector<8x512xf32>
      %19 = arith.addf %16, %18 : vector<8x512xf32>
      %cst_12 = arith.constant 0.000000e+00 : f32
      %20 = vector.broadcast %cst_12 : f32 to vector<8x512xf32>
      %21 = arith.maximumf %19, %20 : vector<8x512xf32>
      %22 = arith.truncf %21 : vector<8x512xf32> to vector<8x512xbf16>
      %c0_13 = arith.constant 0 : index
      %c0_14 = arith.constant 0 : index
      %23 = vector.load %arg6[%c0_13, %c0_14] : memref<1432x128xbf16, #tpu.memory_space<vmem>>, vector<512x128xbf16>
      %cst_15 = arith.constant dense<0.000000e+00> : vector<8x128xf32>
      %24 = tpu.matmul %22, %23, %cst_15 {dimension_numbers = #tpu.dot_dimension_numbers<[1], [0], [0], [1], [0, 0, 1, 1], [], []>} : vector<8x512xbf16>, vector<512x128xbf16>, vector<8x128xf32> -> vector<8x128xf32>
      %c0_16 = arith.constant 0 : index
      %c1152 = arith.constant 1152 : index
      %25 = vector.load %arg7[%c0_16, %c1152] : memref<1x1792xf32, #tpu.memory_space<vmem>>, vector<1x128xf32>
      %26 = vector.broadcast %25 : vector<1x128xf32> to vector<8x128xf32>
      %27 = arith.addf %24, %26 : vector<8x128xf32>
      %cst_17 = arith.constant 0.000000e+00 : f32
      %28 = vector.broadcast %cst_17 : f32 to vector<8x128xf32>
      %29 = arith.maximumf %27, %28 : vector<8x128xf32>
      %c0_18 = arith.constant 0 : index
      %c0_19 = arith.constant 0 : index
      %30 = vector.load %arg2[%c0_18, %c0_19] : memref<8x536xbf16, #tpu.memory_space<vmem>>, vector<8x512xbf16>
      %c512 = arith.constant 512 : index
      %c0_20 = arith.constant 0 : index
      %31 = vector.load %arg6[%c512, %c0_20] : memref<1432x128xbf16, #tpu.memory_space<vmem>>, vector<512x128xbf16>
      %cst_21 = arith.constant dense<0.000000e+00> : vector<8x128xf32>
      %32 = tpu.matmul %30, %31, %cst_21 {dimension_numbers = #tpu.dot_dimension_numbers<[1], [0], [0], [1], [0, 0, 1, 1], [], []>} : vector<8x512xbf16>, vector<512x128xbf16>, vector<8x128xf32> -> vector<8x128xf32>
      %c0_22 = arith.constant 0 : index
      %c1280 = arith.constant 1280 : index
      %33 = vector.load %arg7[%c0_22, %c1280] : memref<1x1792xf32, #tpu.memory_space<vmem>>, vector<1x128xf32>
      %34 = vector.broadcast %33 : vector<1x128xf32> to vector<8x128xf32>
      %35 = arith.addf %32, %34 : vector<8x128xf32>
      %cst_23 = arith.constant 0.000000e+00 : f32
      %36 = vector.broadcast %cst_23 : f32 to vector<8x128xf32>
      %37 = arith.maximumf %35, %36 : vector<8x128xf32>
      %38 = arith.addf %29, %37 : vector<8x128xf32>
      %39 = arith.truncf %38 : vector<8x128xf32> to vector<8x128xbf16>
      %c1024 = arith.constant 1024 : index
      %c0_24 = arith.constant 0 : index
      %40 = vector.load %arg6[%c1024, %c0_24] : memref<1432x128xbf16, #tpu.memory_space<vmem>>, vector<128x128xbf16>
      %cst_25 = arith.constant dense<0.000000e+00> : vector<8x128xf32>
      %41 = tpu.matmul %39, %40, %cst_25 {dimension_numbers = #tpu.dot_dimension_numbers<[1], [0], [0], [1], [0, 0, 1, 1], [], []>} : vector<8x128xbf16>, vector<128x128xbf16>, vector<8x128xf32> -> vector<8x128xf32>
      %c0_26 = arith.constant 0 : index
      %c1408 = arith.constant 1408 : index
      %42 = vector.load %arg7[%c0_26, %c1408] : memref<1x1792xf32, #tpu.memory_space<vmem>>, vector<1x128xf32>
      %43 = vector.broadcast %42 : vector<1x128xf32> to vector<8x128xf32>
      %44 = arith.addf %41, %43 : vector<8x128xf32>
      %cst_27 = arith.constant 0.000000e+00 : f32
      %45 = vector.broadcast %cst_27 : f32 to vector<8x128xf32>
      %46 = arith.maximumf %44, %45 : vector<8x128xf32>
      %47 = arith.truncf %46 : vector<8x128xf32> to vector<8x128xbf16>
      %c0_28 = arith.constant 0 : index
      %c512_29 = arith.constant 512 : index
      %48 = vector.load %arg2[%c0_28, %c512_29] : memref<8x536xbf16, #tpu.memory_space<vmem>>, vector<8x24xbf16>
      %c1152_30 = arith.constant 1152 : index
      %c0_31 = arith.constant 0 : index
      %49 = vector.load %arg6[%c1152_30, %c0_31] : memref<1432x128xbf16, #tpu.memory_space<vmem>>, vector<128x128xbf16>
      %cst_32 = arith.constant dense<0.000000e+00> : vector<8x128xf32>
      %50 = tpu.matmul %47, %49, %cst_32 {dimension_numbers = #tpu.dot_dimension_numbers<[1], [0], [0], [1], [0, 0, 1, 1], [], []>} : vector<8x128xbf16>, vector<128x128xbf16>, vector<8x128xf32> -> vector<8x128xf32>
      %c1280_33 = arith.constant 1280 : index
      %c0_34 = arith.constant 0 : index
      %51 = vector.load %arg6[%c1280_33, %c0_34] : memref<1432x128xbf16, #tpu.memory_space<vmem>>, vector<24x128xbf16>
      %cst_35 = arith.constant dense<0.000000e+00> : vector<8x128xf32>
      %52 = tpu.matmul %48, %51, %cst_35 {dimension_numbers = #tpu.dot_dimension_numbers<[1], [0], [0], [1], [0, 0, 1, 1], [], []>} : vector<8x24xbf16>, vector<24x128xbf16>, vector<8x128xf32> -> vector<8x128xf32>
      %53 = arith.addf %50, %52 : vector<8x128xf32>
      %c0_36 = arith.constant 0 : index
      %c1536 = arith.constant 1536 : index
      %54 = vector.load %arg7[%c0_36, %c1536] : memref<1x1792xf32, #tpu.memory_space<vmem>>, vector<1x128xf32>
      %55 = vector.broadcast %54 : vector<1x128xf32> to vector<8x128xf32>
      %56 = arith.addf %53, %55 : vector<8x128xf32>
      %cst_37 = arith.constant 0.000000e+00 : f32
      %57 = vector.broadcast %cst_37 : f32 to vector<8x128xf32>
      %58 = arith.maximumf %56, %57 : vector<8x128xf32>
      %59 = arith.truncf %58 : vector<8x128xf32> to vector<8x128xbf16>
      %c1304 = arith.constant 1304 : index
      %c0_38 = arith.constant 0 : index
      %60 = vector.load %arg6[%c1304, %c0_38] : memref<1432x128xbf16, #tpu.memory_space<vmem>>, vector<128x128xbf16>
      %cst_39 = arith.constant dense<0.000000e+00> : vector<8x128xf32>
      %61 = tpu.matmul %59, %60, %cst_39 {dimension_numbers = #tpu.dot_dimension_numbers<[1], [0], [0], [1], [0, 0, 1, 1], [], []>} : vector<8x128xbf16>, vector<128x128xbf16>, vector<8x128xf32> -> vector<8x128xf32>
      %c0_40 = arith.constant 0 : index
      %c1664 = arith.constant 1664 : index
      %62 = vector.load %arg7[%c0_40, %c1664] : memref<1x1792xf32, #tpu.memory_space<vmem>>, vector<1x128xf32>
      %63 = vector.broadcast %62 : vector<1x128xf32> to vector<8x128xf32>
      %64 = arith.addf %61, %63 : vector<8x128xf32>
      %65 = vector.extract_strided_slice %64 {offsets = [0, 0], sizes = [8, 4], strides = [1, 1]} : vector<8x128xf32> to vector<8x4xf32>
      %66 = vector.extract_strided_slice %64 {offsets = [0, 4], sizes = [8, 1], strides = [1, 1]} : vector<8x128xf32> to vector<8x1xf32>
      %cst_41 = arith.constant dense<0.000000e+00> : vector<8xf32>
      %67 = vector.multi_reduction <add>, %65, %cst_41 [1] : vector<8x4xf32> to vector<8xf32>
      %68 = vector.shape_cast %67 : vector<8xf32> to vector<8x1xf32>
      %cst_42 = arith.constant 4.000000e+00 : f32
      %69 = vector.broadcast %cst_42 : f32 to vector<8x1xf32>
      %70 = arith.divf %68, %69 : vector<8x1xf32>
      %71 = vector.broadcast %70 : vector<8x1xf32> to vector<8x4xf32>
      %72 = arith.subf %65, %71 : vector<8x4xf32>
      %73 = vector.broadcast %66 : vector<8x1xf32> to vector<8x4xf32>
      %74 = arith.addf %73, %72 : vector<8x4xf32>
      %c0_43 = arith.constant 0 : index
      %c0_44 = arith.constant 0 : index
      %75 = vector.load %arg8[%c0_43, %c0_44] : memref<8x4xf32, #tpu.memory_space<vmem>>, vector<8x4xf32>
      tpu.vector_store %arg8[%c0_43, %c0_44], %74 {strides = array<i32>} : memref<8x4xf32, #tpu.memory_space<vmem>>, vector<8x4xf32>,
    } else {
    }
    return
  }
  func.func @transform_0(%arg0: i32) -> (i32, i32) {
    %c0_i32 = arith.constant 0 : i32
    %c0_i32_0 = arith.constant 0 : i32
    %c0_i32_1 = arith.constant 0 : i32
    return %c0_i32, %c0_i32_0 : i32, i32
  }
  func.func @transform_1(%arg0: i32) -> (i32, i32) {
    %c0_i32 = arith.constant 0 : i32
    %c0_i32_0 = arith.constant 0 : i32
    %c0_i32_1 = arith.constant 0 : i32
    return %c0_i32, %c0_i32_0 : i32, i32
  }
  func.func @transform_2(%arg0: i32) -> (i32, i32) {
    %c0_i32 = arith.constant 0 : i32
    %c0_i32_0 = arith.constant 0 : i32
    %c0_i32_1 = arith.constant 0 : i32
    return %c0_i32, %c0_i32_0 : i32, i32
  }
  func.func @transform_3(%arg0: i32) -> (i32, i32) {
    %c0_i32 = arith.constant 0 : i32
    %c0_i32_0 = arith.constant 0 : i32
    %c0_i32_1 = arith.constant 0 : i32
    return %c0_i32, %c0_i32_0 : i32, i32
  }
  func.func @transform_4(%arg0: i32) -> (i32, i32) {
    %c0_i32 = arith.constant 0 : i32
    %c0_i32_0 = arith.constant 0 : i32
    return %arg0, %c0_i32 : i32, i32
  }
  func.func @transform_5(%arg0: i32) -> (i32, i32) {
    %c0_i32 = arith.constant 0 : i32
    %c0_i32_0 = arith.constant 0 : i32
    %c0_i32_1 = arith.constant 0 : i32
    return %c0_i32, %c0_i32_0 : i32, i32
  }
  func.func @transform_6(%arg0: i32) -> (i32, i32) {
    %c0_i32 = arith.constant 0 : i32
    %c0_i32_0 = arith.constant 0 : i32
    %c0_i32_1 = arith.constant 0 : i32
    return %c0_i32, %c0_i32_0 : i32, i32
  }
  func.func @transform_7(%arg0: i32) -> (i32, i32) {
    %c0_i32 = arith.constant 0 : i32
    %c0_i32_0 = arith.constant 0 : i32
    %c0_i32_1 = arith.constant 0 : i32
    return %c0_i32, %c0_i32_0 : i32, i32
  }
}

</mosaic_0001>

<bundles_post_ra>
// kernel: brain_forward.1
= control target key start
LH: loop header
LB: loop body
LE: loop exit
PB: predicated region body
PF: predicated region fallthrough
CT: control target
= control target key end

     0   :  { %s4570_s24 = smov 0   ;;  %s6045_s0 = inlined_call_operand.vmem [shape: bf16[72,324], index: 0, kind: input, shape index: {}]   ;;  %s6046_s1 = inlined_call_operand.vmem [shape: bf16[8,536], index: 1, kind: input, shape index: {}]   ;;  %s6047_s2 = inlined_call_operand.vmem [shape: bf16[324,288], index: 2, kind: input, shape index: {}]   ;;  %s6048_s3 = inlined_call_operand.vmem [shape: bf16[288,256], index: 3, kind: input, shape index: {}]   ;;  %s6049_s4 = inlined_call_operand.vmem [shape: bf16[2304,512], index: 4, kind: input, shape index: {}]   ;;  %s6050_s5 = inlined_call_operand.vmem [shape: bf16[1432,128], index: 5, kind: input, shape index: {}]   ;;  %s6051_s6 = inlined_call_operand.vmem [shape: f32[1,1792], index: 6, kind: input, shape index: {}]   ;;  %s6052_s7 = inlined_call_operand.vmem [shape: f32[8,4], index: 7, kind: output, shape index: {}]  }
   0x1 LB: > { %s4576_s25 = sadd.s32 4294967295, %s4525_s24   ;;  %p3140_p0 = scmp.ge.s32.totalorder %s4525_s24, 1  ;;  %s4525_s24 = sphi %s4570_s24, %s17_s24  }
   0x2   : > { %p234_p1 = scmp.lt.s32.totalorder %s4525_s24, 10 }
   0x4   : > { %p235_p2 = pnand %p3140_p0, %p234_p1 }
   0x5   : > { %s3141_s26 = sshll.u32 (!%p235_p2), %s4576_s25, 5  ;;  %p3144_p4 = scmp.ne.s32.totalorder (!%p235_p2), %s4576_s25, 0 }
   0x6   : > { %238 = sbr.rel (%p235_p2) target bundleno = 1512 (0x5e8), region = 48  ;;  %p263_p3 = scmp.lt.s32.totalorder (!%p235_p2), %s3141_s26, 287 }
   0xb   : > { %s6054_s26 = smov (!%p263_p3, %s3141_s26), 287  ;;  %273 = sbr.rel (%p3144_p4) target bundleno = 551 (0x227), region = 52 }
   0xc   : > { %s4221_s27 = sshll.u32 %s6054_s26, 4 }
   0xd   : > { %s4584_s30 = scalar_lea.vmem %s6049_s4, %s4221_s27 }
  0x10   : > { %v3279_v0 = vld [vmem:[%s6047_s2 + $0xa8] sm:$0xf]  ;;  %v4256_v1 = vld [vmem:[%s6047_s2 + $0xb0] sm:$0xf0]  ;;  %v4596_v2 = vld [vmem:[%s6047_s2 + $0x1e0] sm:$0x33] }
  0x11   : > { %v3280_v3 = vor.u32 %v4256_v1, %v3279_v0  ;;  %v654_v4 = vunpack.c.l.b16 %v4596_v2  ;;  %v3267_v5 = vld [vmem:[%s6047_s2 + $0x90] sm:$0xf]  ;;  %v4253_v6 = vld [vmem:[%s6047_s2 + $0x98] sm:$0xf0]  ;;  %vm796_vm0 = vcmask 1041408   ;;  %vm780_vm1 = vcmask 556032  }
  0x12   : > { %v3375_v7 = vld [vmem:[%s6047_s2 + $0x168] sm:$0xf]  ;;  %v4280_v8 = vld [vmem:[%s6047_s2 + $0x170] sm:$0xf0]  ;;  %v3268_v10 = vor.u32 %v4253_v6, %v3267_v5  ;;  %v3255_v14 = vld [vmem:[%s6047_s2 + $0x78] sm:$0xf] }
  0x13   : > { %806 = vmatpush.bf16.msra.mxu0 %v3280_v3  ;;  %4484 = vmatpush.bf16.msra.mxu3 %v3280_v3  ;;  %v717_v9 = vpack.c.b16 %v654_v4, %v654_v4  ;;  %v4611_v11 = vor.u32 %v4280_v8, %v3375_v7  ;;  %v3423_v12 = vld [vmem:[%s6047_s2 + $0x1c8] sm:$0xf]  ;;  %v4292_v13 = vld [vmem:[%s6047_s2 + $0x1d0] sm:$0xf0]  ;;  %v4250_v15 = vld [vmem:[%s6047_s2 + $0x80] sm:$0xf0] }
  0x14   : > { %v3363_v16 = vld [vmem:[%s6047_s2 + $0x150] sm:$0xf]  ;;  %v4277_v17 = vld [vmem:[%s6047_s2 + $0x158] sm:$0xf0]  ;;  %v3424_v20 = vor.u32 %v4292_v13, %v3423_v12  ;;  %v3351_v21 = vld [vmem:[%s6047_s2 + $0x138] sm:$0xf]  ;;  %v3256_v23 = vor.u32 %v4250_v15, %v3255_v14 }
  0x15   : > { %v798_v18 = vsel %vm796_vm0, %v717_v9, 0  ;;  %4492 = vmatpush.bf16.msra.mxu1 %v4611_v11  ;;  %v4633_v19 = vor.u32 %v4277_v17, %v3363_v16  ;;  %v4274_v22 = vld [vmem:[%s6047_s2 + $0x140] sm:$0xf0]  ;;  %v3411_v24 = vld [vmem:[%s6047_s2 + $0x1b0] sm:$0xf]  ;;  %vm1367_vm2 = vcmask 261120  }
  0x16   : > { %875 = vmatpush.bf16.msra.mxu2 %v798_v18  ;;  %v4289_v25 = vld [vmem:[%s6047_s2 + $0x1b8] sm:$0xf0]  ;;  %v3243_v26 = vld [vmem:[%s6047_s2 + $0x60] sm:$0xf]  ;;  %v4247_v27 = vld [vmem:[%s6047_s2 + $0x68] sm:$0xf0]  ;;  %v4654_v28 = vor.u32 %v4274_v22, %v3351_v21 }
  0x17   : > { %807 = vmatpush.bf16.msra.mxu0 %v3268_v10  ;;  %4485 = vmatpush.bf16.msra.mxu3 %v3268_v10  ;;  %v3412_v29 = vor.u32 %v4289_v25, %v3411_v24  ;;  %v3339_v30 = vld [vmem:[%s6047_s2 + $0x120] sm:$0xf]  ;;  %v4271_v31 = vld [vmem:[%s6047_s2 + $0x128] sm:$0xf0]  ;;  %v3244_v32 = vor.u32 %v4247_v27, %v3243_v26  ;;  %v3399_v33 = vld [vmem:[%s6047_s2 + $0x198] sm:$0xf] }
  0x18   : > { %v4286_v34 = vld [vmem:[%s6047_s2 + $0x1a0] sm:$0xf0]  ;;  %v3231_v35 = vld [vmem:[%s6047_s2 + $0x48] sm:$0xf]  ;;  %v4244_v36 = vld [vmem:[%s6047_s2 + $0x50] sm:$0xf0]  ;;  %v4675_v37 = vor.u32 %v4271_v31, %v3339_v30 }
  0x19   : > { %4493 = vmatpush.bf16.msra.mxu1 %v4633_v19  ;;  %v3400_v38 = vor.u32 %v4286_v34, %v3399_v33  ;;  %v3327_v39 = vld [vmem:[%s6047_s2 + $0x108] sm:$0xf]  ;;  %v4268_v40 = vld [vmem:[%s6047_s2 + $0x110] sm:$0xf0]  ;;  %v3232_v41 = vor.u32 %v4244_v36, %v3231_v35  ;;  %v3387_v42 = vld [vmem:[%s6047_s2 + $0x180] sm:$0xf] }
  0x1a   : > { %876 = vmatpush.bf16.msra.mxu2 %v3424_v20  ;;  %v4283_v43 = vld [vmem:[%s6047_s2 + $0x188] sm:$0xf0]  ;;  %v3219_v44 = vld [vmem:[%s6047_s2 + $0x30] sm:$0xf]  ;;  %v4241_v45 = vld [vmem:[%s6047_s2 + $0x38] sm:$0xf0]  ;;  %v4702_v48 = vor.u32 %v4268_v40, %v3327_v39 }
  0x1b   : > { %808 = vmatpush.bf16.msra.mxu0 %v3256_v23  ;;  %4486 = vmatpush.bf16.msra.mxu3 %v3256_v23  ;;  %v4279_v46 = vld [vmem:[%s6047_s2 + $0x16c] sm:$0xf]  ;;  %v3377_v47 = vld [vmem:[%s6047_s2 + $0x174] sm:$0xf0]  ;;  %v3155_v49 = vld [vmem:[%s6045_s0 + $0x8] sm:$0xf]  ;;  %v3388_v50 = vor.u32 %v4283_v43, %v3387_v42  ;;  %v3220_v54 = vor.u32 %v4241_v45, %v3219_v44 }
  0x1c   : > { %v4224_v51 = vld [vmem:[%s6045_s0 + $0x10] sm:$0xf0]  ;;  %v3315_v52 = vld [vmem:[%s6047_s2 + $0xf0] sm:$0xf]  ;;  %v4265_v53 = vld [vmem:[%s6047_s2 + $0xf8] sm:$0xf0]  ;;  %v3380_v55 = vor.u32 %v4279_v46, %v3377_v47 }
  0x1d   : > { %4494 = vmatpush.bf16.msra.mxu1 %v4654_v28  ;;  %v3207_v56 = vld [vmem:[%s6047_s2 + $0x18] sm:$0xf]  ;;  %v4238_v57 = vld [vmem:[%s6047_s2 + $0x20] sm:$0xf0]  ;;  %v4276_v58 = vld [vmem:[%s6047_s2 + $0x154] sm:$0xf]  ;;  %v4729_v60 = vor.u32 %v4224_v51, %v3155_v49  ;;  %v4731_v61 = vor.u32 %v4265_v53, %v3315_v52 }
  0x1e   : > { %877 = vmatpush.bf16.msra.mxu2 %v3412_v29  ;;  %v3365_v59 = vld [vmem:[%s6047_s2 + $0x15c] sm:$0xf0]  ;;  %v3303_v62 = vld [vmem:[%s6047_s2 + $0xd8] sm:$0xf]  ;;  %v4262_v63 = vld [vmem:[%s6047_s2 + $0xe0] sm:$0xf0]  ;;  %v3208_v0 = vor.u32 %v4238_v57, %v3207_v56 }
  0x1f   : > { %809 = vmatpush.bf16.msra.mxu0 %v3244_v32  ;;  %4487 = vmatpush.bf16.msra.mxu3 %v3244_v32  ;;  %v3195_v1 = vld [vmem:[%s6047_s2] sm:$0xf]  ;;  %v3368_v3 = vor.u32 %v4276_v58, %v3365_v59  ;;  %v4235_v4 = vld [vmem:[%s6047_s2 + $0x8] sm:$0xf0]  ;;  %v4273_v5 = vld [vmem:[%s6047_s2 + $0x13c] sm:$0xf]  ;;  %v4754_v7 = vor.u32 %v4262_v63, %v3303_v62  ;;  %v655_v63 = vunpack.c.h.b16 %v4596_v2 }
  0x20   : > { %v3353_v6 = vld [vmem:[%s6047_s2 + $0x144] sm:$0xf0]  ;;  %v3291_v8 = vld [vmem:[%s6047_s2 + $0xc0] sm:$0xf]  ;;  %v4259_v9 = vld [vmem:[%s6047_s2 + $0xc8] sm:$0xf0]  ;;  %v3196_v13 = vor.u32 %v4235_v4, %v3195_v1 }
  0x21   : > { %4495 = vmatpush.bf16.msra.mxu1 %v4675_v37  ;;  %v4255_v10 = vld [vmem:[%s6047_s2 + $0xac] sm:$0xf]  ;;  %v3281_v12 = vld [vmem:[%s6047_s2 + $0xb4] sm:$0xf0]  ;;  %v3147_v14 = vld [vmem:[%s6045_s0] sm:$0xf]  ;;  %v3356_v17 = vor.u32 %v4273_v5, %v3353_v6  ;;  %v4787_v22 = vor.u32 %v4259_v9, %v3291_v8  ;;  %v718_v8 = vpack.c.b16 %v655_v63, %v655_v63 }
  0x22   : > { %878 = vmatpush.bf16.msra.mxu2 %v3400_v38  ;;  %v4223_v15 = vld [vmem:[%s6045_s0 + $0x8] sm:$0xf0]  ;;  %v3171_v16 = vld [vmem:[%s6045_s0 + $0x30] sm:$0xf]  ;;  %v4229_v18 = vld [vmem:[%s6045_s0 + $0x38] sm:$0xf0]  ;;  %v3284_v25 = vor.u32 %v4255_v10, %v3281_v12 }
  0x23   : > { %810 = vmatpush.bf16.msra.mxu0 %v3232_v41  ;;  %4488 = vmatpush.bf16.msra.mxu3 %v3232_v41  ;;  %v4270_v20 = vld [vmem:[%s6047_s2 + $0x124] sm:$0xf]  ;;  %v3341_v21 = vld [vmem:[%s6047_s2 + $0x12c] sm:$0xf0]  ;;  %v4225_v23 = vld [vmem:[%s6045_s0 + $0x1c] sm:$0xf]  ;;  %v4795_v26 = vor.u32 %v4223_v15, %v3147_v14  ;;  %v4803_v30 = vor.u32 %v4229_v18, %v3171_v16 }
  0x24   : > { %v3161_v24 = vld [vmem:[%s6045_s0 + $0x24] sm:$0xf0]  ;;  %v4252_v27 = vld [vmem:[%s6047_s2 + $0x94] sm:$0xf]  ;;  %v3269_v29 = vld [vmem:[%s6047_s2 + $0x9c] sm:$0xf0]  ;;  %v3344_v31 = vor.u32 %v4270_v20, %v3341_v21 }
  0x25   : > { %4496 = vmatpush.bf16.msra.mxu1 %v4702_v48  ;;  %v4806_v32 = vor.u32 %v4225_v23, %v3161_v24  ;;  %v4267_v33 = vld [vmem:[%s6047_s2 + $0x10c] sm:$0xf]  ;;  %v3329_v34 = vld [vmem:[%s6047_s2 + $0x114] sm:$0xf0]  ;;  %v3167_v35 = vld [vmem:[%s6045_s0 + $0x20] sm:$0xf]  ;;  %v3272_v36 = vor.u32 %v4252_v27, %v3269_v29 }
  0x26   : > { %879 = vmatpush.bf16.msra.mxu2 %v3388_v50  ;;  %v4249_v38 = vld [vmem:[%s6047_s2 + $0x7c] sm:$0xf]  ;;  %v3257_v39 = vld [vmem:[%s6047_s2 + $0x84] sm:$0xf0]  ;;  %v3332_v40 = vor.u32 %v4267_v33, %v3329_v34  ;;  %v4246_v43 = vld [vmem:[%s6047_s2 + $0x64] sm:$0xf] }
  0x27   : > { %811 = vmatpush.bf16.msra.mxu0 %v3220_v54  ;;  %4489 = vmatpush.bf16.msra.mxu3 %v3220_v54  ;;  %v3260_v42 = vor.u32 %v4249_v38, %v3257_v39  ;;  %v3245_v44 = vld [vmem:[%s6047_s2 + $0x6c] sm:$0xf0]  ;;  %v4264_v45 = vld [vmem:[%s6047_s2 + $0xf4] sm:$0xf]  ;;  %v3317_v46 = vld [vmem:[%s6047_s2 + $0xfc] sm:$0xf0] }
  0x28   : > { %v4243_v47 = vld [vmem:[%s6047_s2 + $0x4c] sm:$0xf]  ;;  %v3320_v49 = vor.u32 %v4264_v45, %v3317_v46  ;;  %v3159_v50 = vld [vmem:[%s6045_s0 + $0x18] sm:$0xf]  ;;  %v4226_v51 = vld [vmem:[%s6045_s0 + $0x20] sm:$0xf0] }
  0x29   : > { %3433 = vmatmul.msk.bf16.vlgmr.msra.gmra.mxu2 %vm780_vm1, %v4729_v60  ;;  %4497 = vmatpush.bf16.msra.mxu1 %v4731_v61  ;;  %v3183_v52 = vld [vmem:[%s6045_s0 + $0x48] sm:$0xf]  ;;  %v4232_v53 = vld [vmem:[%s6045_s0 + $0x50] sm:$0xf0]  ;;  %v3221_v58 = vld [vmem:[%s6047_s2 + $0x3c] sm:$0xf0] }
  0x2a   : > { %938 = vmatpush.bf16.msrb.mxu2 %v3380_v55  ;;  %v4228_v54 = vld [vmem:[%s6045_s0 + $0x34] sm:$0xf]  ;;  %v3173_v55 = vld [vmem:[%s6045_s0 + $0x3c] sm:$0xf0]  ;;  %v4881_v59 = vor.u32 %v4232_v53, %v3183_v52  ;;  %v3209_v2 = vld [vmem:[%s6047_s2 + $0x24] sm:$0xf0] }
  0x2b   : > { %812 = vmatpush.bf16.msra.mxu0 %v3208_v0  ;;  %4490 = vmatpush.bf16.msra.mxu3 %v3208_v0  ;;  %v4240_v57 = vld [vmem:[%s6047_s2 + $0x34] sm:$0xf]  ;;  %v4884_v62 = vor.u32 %v4228_v54, %v3173_v55  ;;  %v3179_v0 = vld [vmem:[%s6045_s0 + $0x38] sm:$0xf]  ;;  %v4261_v4 = vld [vmem:[%s6047_s2 + $0xdc] sm:$0xf] }
  0x2c   : > { %v3224_v1 = vor.u32 %v4240_v57, %v3221_v58  ;;  %v3305_v5 = vld [vmem:[%s6047_s2 + $0xe4] sm:$0xf0]  ;;  %v4234_v12 = vld [vmem:[%s6047_s2 + $0x4] sm:$0xf]  ;;  %v801_v15 = vsel %vm796_vm0, %v718_v8, 0 }
  0x2d   : > { %4498 = vmatpush.bf16.msra.mxu1 %v4754_v7  ;;  %v3308_v6 = vor.u32 %v4261_v4, %v3305_v5  ;;  %v4291_v16 = vld [vmem:[%s6047_s2 + $0x1cc] sm:$0xf]  ;;  %v3293_v18 = vld [vmem:[%s6047_s2 + $0xcc] sm:$0xf0]  ;;  %v4222_v20 = vld [vmem:[%s6045_s0 + $0x4] sm:$0xf] }
  0x2e   : > { %939 = vmatpush.bf16.msrb.mxu2 %v3368_v3  ;;  %v4230_v3 = vld [vmem:[%s6045_s0 + $0x40] sm:$0xf0]  ;;  %v3149_v21 = vld [vmem:[%s6045_s0 + $0xc] sm:$0xf0]  ;;  %v3185_v27 = vld [vmem:[%s6045_s0 + $0x54] sm:$0xf0] }
  0x2f   : > { %813 = vmatpush.bf16.msra.mxu0 %v3196_v13  ;;  %4491 = vmatpush.bf16.msra.mxu3 %v3196_v13  ;;  %v4909_v9 = vor.u32 %v4230_v3, %v3179_v0  ;;  %v3197_v13 = vld [vmem:[%s6047_s2 + $0xc] sm:$0xf0]  ;;  %v4288_v33 = vld [vmem:[%s6047_s2 + $0x1b4] sm:$0xf]  ;;  %v4233_v38 = vld [vmem:[%s6045_s0 + $0x58] sm:$0xf0] }
  0x30   : > { %v3200_v14 = vor.u32 %v4234_v12, %v3197_v13  ;;  %v4285_v39 = vld [vmem:[%s6047_s2 + $0x19c] sm:$0xf]  ;;  %v4282_v46 = vld [vmem:[%s6047_s2 + $0x184] sm:$0xf]  ;;  %v3371_v54 = vld [vmem:[%s6047_s2 + $0x158] sm:$0xf] }
  0x31   : > { %4499 = vmatpush.bf16.msra.mxu1 %v4787_v22  ;;  %v4278_v55 = vld [vmem:[%s6047_s2 + $0x160] sm:$0xf0]  ;;  %v291_v63 = vld [vmem:[%s6045_s0 + $0x68] sm:$0xf]  ;;  %v3431_v5 = vld [vmem:[%s6047_s2 + $0x1d0] sm:$0xf] }
  0x32   : > { %940 = vmatpush.bf16.msrb.mxu2 %v3356_v17  ;;  %814 = vmatmul.bf16.vlgmr.msra.gmra.mxu0 %v4795_v26  ;;  %v4258_v17 = vld [vmem:[%s6047_s2 + $0xc4] sm:$0xf]  ;;  %v426_v3 = vunpack.c.l.b16 %v291_v63  ;;  %v4293_v8 = vld [vmem:[%s6047_s2 + $0x1d8] sm:$0xf0]  ;;  %v4275_v12 = vld [vmem:[%s6047_s2 + $0x148] sm:$0xf0] }
  0x33   : > { %839 = vmatpush.bf16.msrb.mxu0 %v4611_v11  ;;  %905 = vmatpush.bf16.msrb.mxu3 %v3284_v25  ;;  %v4227_v11 = vld [vmem:[%s6045_s0 + $0x28] sm:$0xf0]  ;;  %v3296_v24 = vor.u32 %v4258_v17, %v3293_v18  ;;  %v4254_v4 = vld [vmem:[%s6047_s2 + $0xa0] sm:$0xf0]  ;;  %v3432_v13 = vor.u32 %v4293_v8, %v3431_v5  ;;  %v4272_v17 = vld [vmem:[%s6047_s2 + $0x130] sm:$0xf0] }
  0x34   : > { %824 = vmatmul.bf16.vlgmr.msra.gmra.mxu3 %v4803_v30  ;;  %852 = vmatmul.bf16.vlgmr.msra.gmra.mxu1 %v4806_v32  ;;  %v4831_v41 = vor.u32 %v4227_v11, %v3167_v35  ;;  %v4231_v25 = vld [vmem:[%s6045_s0 + $0x4c] sm:$0xf]  ;;  %v3191_v11 = vld [vmem:[%s6045_s0 + $0x50] sm:$0xf]  ;;  %v4236_v63 = vld [vmem:[%s6047_s2 + $0x10] sm:$0xf0] }
  0x35   : > { %v4962_v35 = vor.u32 %v4231_v25, %v3185_v27  ;;  %v4290_v25 = vld [vmem:[%s6047_s2 + $0x1c0] sm:$0xf0]  ;;  %v3335_v27 = vld [vmem:[%s6047_s2 + $0x110] sm:$0xf] }
  0x36   : > { %941 = vmatpush.bf16.msrb.mxu2 %v3344_v31  ;;  %v4952_v31 = vor.u32 %v4222_v20, %v3149_v21  ;;  %v3251_v20 = vld [vmem:[%s6047_s2 + $0x68] sm:$0xf]  ;;  %v4248_v21 = vld [vmem:[%s6047_s2 + $0x70] sm:$0xf0]  ;;  %v3506_v5 = vld [vmem:[%s6048_s3 + $0x70] sm:$0xf] }
  0x37   : > { %840 = vmatpush.bf16.msrb.mxu0 %v4633_v19  ;;  %906 = vmatpush.bf16.msrb.mxu3 %v3272_v36  ;;  %v3248_v19 = vor.u32 %v4246_v43, %v3245_v44  ;;  %v4281_v43 = vld [vmem:[%s6047_s2 + $0x178] sm:$0xf0]  ;;  %v4985_v44 = vor.u32 %v4233_v38, %v3191_v11 }
  0x38   : > { %v4245_v11 = vld [vmem:[%s6047_s2 + $0x58] sm:$0xf0] }
  0x39   : > { %3434 = vmatmul.msk.bf16.gmra.mxu2 %vm780_vm1, %v4831_v41 }
  0x3a   : > { %942 = vmatpush.bf16.msrb.mxu2 %v3332_v40  ;;  %v3401_v40 = vld [vmem:[%s6047_s2 + $0x1a4] sm:$0xf0] }
  0x3b   : > { %841 = vmatpush.bf16.msrb.mxu0 %v4654_v28  ;;  %907 = vmatpush.bf16.msrb.mxu3 %v3260_v42  ;;  %v3233_v28 = vld [vmem:[%s6047_s2 + $0x54] sm:$0xf0]  ;;  %v3383_v42 = vld [vmem:[%s6047_s2 + $0x170] sm:$0xf] }
  0x3c   : > { %v3236_v56 = vor.u32 %v4243_v47, %v3233_v28  ;;  %v3384_v45 = vor.u32 %v4281_v43, %v3383_v42  ;;  %v3389_v47 = vld [vmem:[%s6047_s2 + $0x18c] sm:$0xf0]  ;;  %v373_v28 = vld [vmem:[%s6047_s2 + $0x1e8] sm:$0x3]  ;;  %v3227_v43 = vld [vmem:[%s6047_s2 + $0x38] sm:$0xf] }
  0x3d   : > { %v656_v52 = vunpack.c.l.b16 %v373_v28 }
  0x3e   : > { %943 = vmatpush.bf16.msrb.mxu2 %v3320_v49  ;;  %v3392_v49 = vor.u32 %v4282_v46, %v3389_v47  ;;  %v4287_v47 = vld [vmem:[%s6047_s2 + $0x1a8] sm:$0xf0] }
  0x3f   : > { %842 = vmatpush.bf16.msrb.mxu0 %v4675_v37  ;;  %908 = vmatpush.bf16.msrb.mxu3 %v3248_v19  ;;  %v4873_v37 = vor.u32 %v4226_v51, %v3159_v50  ;;  %v3404_v19 = vor.u32 %v4285_v39, %v3401_v40  ;;  %v3287_v50 = vld [vmem:[%s6047_s2 + $0xb0] sm:$0xf]  ;;  %v4257_v51 = vld [vmem:[%s6047_s2 + $0xb8] sm:$0xf0]  ;;  %v719_v58 = vpack.c.b16 %v656_v52, %v656_v52  ;;  %v3323_v39 = vld [vmem:[%s6047_s2 + $0xf8] sm:$0xf] }
  0x40   : > { %v3288_v53 = vor.u32 %v4257_v51, %v3287_v50  ;;  %v4266_v40 = vld [vmem:[%s6047_s2 + $0x100] sm:$0xf0]  ;;  %v4263_v50 = vld [vmem:[%s6047_s2 + $0xe8] sm:$0xf0]  ;;  %v3215_v52 = vld [vmem:[%s6047_s2 + $0x20] sm:$0xf] }
  0x41   : > { %v804_v0 = vsel %vm796_vm0, %v719_v58, 0  ;;  %v3324_v42 = vor.u32 %v4266_v40, %v3323_v39  ;;  %v3203_v58 = vld [vmem:[%s6047_s2 + $0x8] sm:$0xf] }
  0x42   : > { %819 = vmatmul.bf16.gmra.mxu0 %v4873_v37  ;;  %944 = vmatpush.bf16.msrb.mxu2 %v3308_v6 }
  0x43   : > { %843 = vmatpush.bf16.msrb.mxu0 %v4702_v48  ;;  %909 = vmatpush.bf16.msrb.mxu3 %v3236_v56  ;;  %v4237_v48 = vld [vmem:[%s6047_s2 + $0x1c] sm:$0xf]  ;;  %v3372_v56 = vor.u32 %v4278_v55, %v3371_v54  ;;  %v3299_v54 = vld [vmem:[%s6047_s2 + $0xc8] sm:$0xf] }
  0x44   : > { %829 = vmatmul.bf16.gmra.mxu3 %v4881_v59  ;;  %857 = vmatmul.bf16.gmra.mxu1 %v4884_v62  ;;  %v3212_v10 = vor.u32 %v4237_v48, %v3209_v2  ;;  %v5021_v48 = vpack.c.b16 %v426_v3, %v426_v3  ;;  %v3275_v2 = vld [vmem:[%s6047_s2 + $0x98] sm:$0xf]  ;;  %v3395_v3 = vld [vmem:[%s6047_s2 + $0x188] sm:$0xf] }
  0x45   : > { %1004 = vmatpush.bf16.msrb.mxu1 %v3288_v53  ;;  %v3276_v6 = vor.u32 %v4254_v4, %v3275_v2  ;;  %v4239_v53 = vld [vmem:[%s6047_s2 + $0x28] sm:$0xf0]  ;;  %v4284_v2 = vld [vmem:[%s6047_s2 + $0x190] sm:$0xf0] }
  0x46   : > { %945 = vmatpush.bf16.msrb.mxu2 %v3296_v24  ;;  %v3252_v24 = vor.u32 %v4248_v21, %v3251_v20  ;;  %v3216_v55 = vor.u32 %v4239_v53, %v3215_v52  ;;  %v3396_v4 = vor.u32 %v4284_v2, %v3395_v3  ;;  %v3482_v20 = vld [vmem:[%s6048_s3 + $0x40] sm:$0xf]  ;;  %v3538_v2 = vld [vmem:[%s6048_s3 + $0xb0] sm:$0xf] }
  0x47   : > { %844 = vmatpush.bf16.msrb.mxu0 %v4731_v61  ;;  %910 = vmatpush.bf16.msrb.mxu3 %v3224_v1  ;;  %v4921_v61 = vld [vmem:[%s6045_s0 + $0x60] sm:$0xff] }
  0x48   : > { %v424_v23 = vunpack.c.l.b16 %v4921_v61  ;;  %v425_v57 = vunpack.c.h.b16 %v4921_v61 }
  0x49   : > { %3435 = vmatmul.msk.bf16.gmra.mxu2 %vm780_vm1, %v4909_v9  ;;  %1005 = vmatpush.bf16.msrb.mxu1 %v3276_v6  ;;  %v4309_v6 = vld [vmem:[%s6048_s3 + $0x74] sm:$0xf0] }
  0x4a   : > { %v4960_v34 = vpack.c.b16 %v424_v23, %v424_v23  ;;  %1073 = vmatpush.bf16.msra.mxu2 %v804_v0  ;;  %v5015_v1 = vpack.c.b16 %v425_v57, %v425_v57  ;;  %v3419_v23 = vld [vmem:[%s6047_s2 + $0x1b8] sm:$0xf]  ;;  %v3204_v0 = vor.u32 %v4236_v63, %v3203_v58  ;;  %v3507_v8 = vor.u32 %v4309_v6, %v3506_v5  ;;  %v5255_v5 = vld [vmem:[%s6051_s6] sm:$0x7] }
  0x4b   : > { %845 = vmatpush.bf16.msrb.mxu0 %v4754_v7  ;;  %911 = vmatpush.bf16.msrb.mxu3 %v3212_v10  ;;  %v3425_v7 = vld [vmem:[%s6047_s2 + $0x1d4] sm:$0xf0]  ;;  %v3359_v10 = vld [vmem:[%s6047_s2 + $0x140] sm:$0xf] }
  0x4c   : > { %v3428_v29 = vor.u32 %v4291_v16, %v3425_v7  ;;  %v3360_v61 = vor.u32 %v4275_v12, %v3359_v10  ;;  %v3347_v7 = vld [vmem:[%s6047_s2 + $0x128] sm:$0xf]  ;;  %v4325_v10 = vld [vmem:[%s6048_s3 + $0xf4] sm:$0xf0]  ;;  %v3498_v12 = vld [vmem:[%s6048_s3 + $0x60] sm:$0xf] }
  0x4d   : > { %v3348_v18 = vor.u32 %v4272_v17, %v3347_v7  ;;  %v3562_v17 = vld [vmem:[%s6048_s3 + $0xe0] sm:$0xf] }
  0x4e   : > { %1074 = vmatpush.bf16.msra.mxu2 %v3432_v13 }
  0x4f   : > { %846 = vmatpush.bf16.msrb.mxu0 %v4787_v22  ;;  %912 = vmatpush.bf16.msrb.mxu3 %v3200_v14  ;;  %v3413_v22 = vld [vmem:[%s6047_s2 + $0x1bc] sm:$0xf0] }
  0x50   : > { %v3416_v36 = vor.u32 %v4288_v33, %v3413_v22  ;;  %v3263_v14 = vld [vmem:[%s6047_s2 + $0x80] sm:$0xf]  ;;  %v3420_v33 = vor.u32 %v4290_v25, %v3419_v23  ;;  %v4303_v23 = vld [vmem:[%s6048_s3 + $0x44] sm:$0xf0]  ;;  %v3474_v25 = vld [vmem:[%s6048_s3 + $0x30] sm:$0xf] }
  0x52   : > { %847 = vmatmul.bf16.vlgmr.msrb.gmra.mxu0 %v4952_v31  ;;  %1075 = vmatpush.bf16.msra.mxu2 %v3420_v33 }
  0x53   : > { %974 = vmatpush.bf16.msra.mxu0 %v801_v15  ;;  %1037 = vmatpush.bf16.msra.mxu3 %v3384_v45  ;;  %v4251_v15 = vld [vmem:[%s6047_s2 + $0x88] sm:$0xf0]  ;;  %v3407_v45 = vld [vmem:[%s6047_s2 + $0x1a0] sm:$0xf] }
  0x54   : > { %834 = vmatmul.bf16.gmra.mxu3 %v4960_v34  ;;  %862 = vmatmul.bf16.gmra.mxu1 %v4962_v35  ;;  %v3264_v16 = vor.u32 %v4251_v15, %v3263_v14  ;;  %v3408_v28 = vor.u32 %v4287_v47, %v3407_v45  ;;  %v3490_v15 = vld [vmem:[%s6048_s3 + $0x50] sm:$0xf] }
  0x55   : > { %v3554_v45 = vld [vmem:[%s6048_s3 + $0xd0] sm:$0xf] }
  0x56   : > { %1006 = vmatpush.bf16.msrb.mxu1 %v3264_v16  ;;  %1076 = vmatpush.bf16.msra.mxu2 %v3408_v28  ;;  %v4305_v16 = vld [vmem:[%s6048_s3 + $0x54] sm:$0xf0] }
  0x57   : > { %975 = vmatpush.bf16.msra.mxu0 %v3428_v29  ;;  %1038 = vmatpush.bf16.msra.mxu3 %v3372_v56  ;;  %v4269_v29 = vld [vmem:[%s6047_s2 + $0x118] sm:$0xf0]  ;;  %v4260_v56 = vld [vmem:[%s6047_s2 + $0xd0] sm:$0xf0]  ;;  %v3491_v7 = vor.u32 %v4305_v16, %v3490_v15 }
  0x58   : > { %v3336_v22 = vor.u32 %v4269_v29, %v3335_v27  ;;  %v3300_v57 = vor.u32 %v4260_v56, %v3299_v54  ;;  %v4301_v27 = vld [vmem:[%s6048_s3 + $0x34] sm:$0xf0] }
  0x59   : > { %3436 = vmatmul.msk.bf16.gmra.mxu2 %vm780_vm1, %v4985_v44  ;;  %v3475_v33 = vor.u32 %v4301_v27, %v3474_v25  ;;  %v4306_v27 = vld [vmem:[%s6048_s3 + $0x64] sm:$0xf] }
  0x5a   : > { %1007 = vmatpush.bf16.msrb.mxu1 %v3252_v24  ;;  %1077 = vmatpush.bf16.msra.mxu2 %v3396_v4 }
  0x5b   : > { %976 = vmatpush.bf16.msra.mxu0 %v3416_v36  ;;  %1039 = vmatpush.bf16.msra.mxu3 %v3360_v61  ;;  %v3239_v36 = vld [vmem:[%s6047_s2 + $0x50] sm:$0xf]  ;;  %v4307_v61 = vld [vmem:[%s6048_s3 + $0x64] sm:$0xf0] }
  0x5c   : > { %v3240_v38 = vor.u32 %v4245_v11, %v3239_v36  ;;  %v3499_v14 = vor.u32 %v4307_v61, %v3498_v12  ;;  %v3466_v36 = vld [vmem:[%s6048_s3 + $0x20] sm:$0xf]  ;;  %v4299_v11 = vld [vmem:[%s6048_s3 + $0x24] sm:$0xf0] }
  0x5d   : > { %v3530_v12 = vld [vmem:[%s6048_s3 + $0xa0] sm:$0xf] }
  0x5e   : > { %1008 = vmatpush.bf16.msrb.mxu1 %v3240_v38  ;;  %v3467_v38 = vor.u32 %v4299_v11, %v3466_v36 }
  0x5f   : > { %977 = vmatpush.bf16.msra.mxu0 %v3404_v19  ;;  %1040 = vmatpush.bf16.msra.mxu3 %v3348_v18  ;;  %v4242_v19 = vld [vmem:[%s6047_s2 + $0x40] sm:$0xf0]  ;;  %v4323_v18 = vld [vmem:[%s6048_s3 + $0xe4] sm:$0xf0] }
  0x60   : > { %v3228_v46 = vor.u32 %v4242_v19, %v3227_v43  ;;  %v3563_v21 = vor.u32 %v4323_v18, %v3562_v17  ;;  %v4297_v43 = vld [vmem:[%s6048_s3 + $0x14] sm:$0xf0]  ;;  %v4308_v18 = vld [vmem:[%s6048_s3 + $0x74] sm:$0xf] }
  0x62   : > { %1009 = vmatpush.bf16.msrb.mxu1 %v3228_v46 }
  0x63   : > { %978 = vmatpush.bf16.msra.mxu0 %v3392_v49  ;;  %1041 = vmatpush.bf16.msra.mxu3 %v3336_v22  ;;  %v3311_v49 = vld [vmem:[%s6047_s2 + $0xe0] sm:$0xf] }
  0x64   : > { %913 = vmatmul.bf16.vlgmr.msrb.gmra.mxu3 %v4795_v26  ;;  %867 = vmatmul.bf16.gmra.mxu1 %v5015_v1  ;;  %v3312_v51 = vor.u32 %v4263_v50, %v3311_v49  ;;  %v3450_v49 = vld [vmem:[%s6048_s3] sm:$0xf]  ;;  %v4295_v50 = vld [vmem:[%s6048_s3 + $0x4] sm:$0xf0] }
  0x66   : > { %3438 = vmatmul.msk.bf16.vlgmr.msra.gmra.mxu0 %vm780_vm1, %v4729_v60  ;;  %1010 = vmatpush.bf16.msrb.mxu1 %v3216_v55  ;;  %v4319_v55 = vld [vmem:[%s6048_s3 + $0xc4] sm:$0xf0] }
  0x67   : > { %1042 = vmatpush.bf16.msra.mxu3 %v3324_v42  ;;  %1383 = vmatpush.bf16.msrb.mxu0 %v3507_v8  ;;  %v3458_v42 = vld [vmem:[%s6048_s3 + $0x10] sm:$0xf] }
  0x68   : > { %v3459_v46 = vor.u32 %v4297_v43, %v3458_v42  ;;  %v4304_v42 = vld [vmem:[%s6048_s3 + $0x54] sm:$0xf]  ;;  %v3492_v43 = vld [vmem:[%s6048_s3 + $0x58] sm:$0xf0] }
  0x69   : > { %3437 = vmatmul.msk.bf16.gmra.mxu2 %vm780_vm1, %v5021_v48 }
  0x6a   : > { %1011 = vmatpush.bf16.msrb.mxu1 %v3204_v0 }
  0x6b   : > { %1043 = vmatpush.bf16.msra.mxu3 %v3312_v51  ;;  %1384 = vmatpush.bf16.msrb.mxu0 %v3499_v14  ;;  %v3451_v51 = vor.u32 %v4295_v50, %v3450_v49 }
  0x6f   : > { %1044 = vmatpush.bf16.msra.mxu3 %v3300_v57  ;;  %1385 = vmatpush.bf16.msrb.mxu0 %v3491_v7 }
  0x74   : > { %918 = vmatmul.bf16.gmra.mxu3 %v4873_v37  ;;  %1012 = vmatmul.bf16.vlgmr.msrb.gmra.mxu1 %v4795_v26  ;;  %v3570_v26 = vld [vmem:[%s6048_s3 + $0xf0] sm:$0xf] }
  0x75   : > { %v3571_v13 = vor.u32 %v4325_v10, %v3570_v26 }
  0x76   : > { %3439 = vmatmul.msk.bf16.gmra.mxu0 %vm780_vm1, %v4831_v41 }
  0x77   : > { %1416 = vmatpush.bf16.msra.mxu1 %v3571_v13  ;;  %v4315_v13 = vld [vmem:[%s6048_s3 + $0xa4] sm:$0xf0] }
  0x78   : > { %v3531_v61 = vor.u32 %v4315_v13, %v3530_v12 }
  0x79   : > { %946 = vmatmul.bf16.vlgmr.msrb.gmra.mxu2 %v4952_v31 }
  0x7b   : > { %1417 = vmatpush.bf16.msra.mxu1 %v3563_v21 }
  0x84   : > { %923 = vmatmul.bf16.gmra.mxu3 %v4803_v30  ;;  %1017 = vmatmul.bf16.gmra.mxu1 %v4873_v37  ;;  %v3483_v37 = vor.u32 %v4303_v23, %v3482_v20  ;;  %v3508_v20 = vld [vmem:[%s6048_s3 + $0x78] sm:$0xf0] }
  0x85   : > { %v3511_v23 = vor.u32 %v4308_v18, %v3508_v20  ;;  %v3468_v18 = vld [vmem:[%s6048_s3 + $0x28] sm:$0xf0] }
  0x86   : > { %3440 = vmatmul.msk.bf16.gmra.mxu0 %vm780_vm1, %v4909_v9 }
  0x87   : > { %1386 = vmatpush.bf16.msrb.mxu0 %v3483_v37  ;;  %1482 = vmatpush.bf16.msrb.mxu2 %v3511_v23  ;;  %v4324_v23 = vld [vmem:[%s6048_s3 + $0xf4] sm:$0xf] }
  0x89   : > { %951 = vmatmul.bf16.gmra.mxu2 %v4806_v32 }
  0x8b   : > { %1387 = vmatpush.bf16.msrb.mxu0 %v3475_v33 }
  0x8f   : > { %1388 = vmatpush.bf16.msrb.mxu0 %v3467_v38 }
  0x93   : > { %1389 = vmatpush.bf16.msrb.mxu0 %v3459_v46  ;;  %v3522_v46 = vld [vmem:[%s6048_s3 + $0x90] sm:$0xf] }
  0x94   : > { %928 = vmatmul.bf16.gmra.mxu3 %v4881_v59  ;;  %1022 = vmatmul.bf16.gmra.mxu1 %v4803_v30  ;;  %v3546_v30 = vld [vmem:[%s6048_s3 + $0xc0] sm:$0xf] }
  0x95   : > { %v3547_v56 = vor.u32 %v4319_v55, %v3546_v30 }
  0x96   : > { %3441 = vmatmul.msk.bf16.gmra.mxu0 %vm780_vm1, %v4985_v44 }
  0x97   : > { %1390 = vmatpush.bf16.msrb.mxu0 %v3451_v51  ;;  %v4302_v51 = vld [vmem:[%s6048_s3 + $0x44] sm:$0xf] }
  0x99   : > { %956 = vmatmul.bf16.gmra.mxu2 %v4884_v62 }
  0xa4   : > { %933 = vmatmul.bf16.gmra.mxu3 %v4960_v34  ;;  %1027 = vmatmul.bf16.gmra.mxu1 %v4881_v59 }
  0xa6   : > { %3442 = vmatmul.msk.bf16.gmra.mxu0 %vm780_vm1, %v5021_v48 }
  0xa9   : > { %961 = vmatmul.bf16.gmra.mxu2 %v4962_v35 }
  0xac   : > { %v5181_v24 = vpop.f32.mrf.mxu2 }
  0xaf   : > { %v815_v29 = vpop.f32.mrf.mxu0 }
  0xb1   : > { %v5189_v22 = vpop.f32.mrf.mxu1 }
  0xb4   : > { %1045 = vmatmul.bf16.vlgmr.msra.gmra.mxu3 %v4952_v31  ;;  %v5198_v39 = vpop.f32.mrf.mxu2  ;;  %v4321_v31 = vld [vmem:[%s6048_s3 + $0xd4] sm:$0xf0]  ;;  %1032 = vmatmul.bf16.gmra.mxu1 %v4960_v34 }
  0xb5   : > { %v3555_v47 = vor.u32 %v4321_v31, %v3554_v45  ;;  %v3495_v45 = vor.u32 %v4304_v42, %v3492_v43  ;;  %v4328_v42 = vld [vmem:[%s6048_s3 + $0x114] sm:$0xf]  ;;  %v3588_v43 = vld [vmem:[%s6048_s3 + $0x118] sm:$0xf0] }
  0xb7   : > { %v5200_v40 = vpop.f32.mrf.mxu3  ;;  %v817_v19 = vpop.f32.mrf.mxu0  ;;  %1418 = vmatpush.bf16.msra.mxu1 %v3555_v47  ;;  %v4313_v47 = vld [vmem:[%s6048_s3 + $0x94] sm:$0xf0] }
  0xb8   : > { %v3523_v50 = vor.u32 %v4313_v47, %v3522_v46  ;;  %v4294_v46 = vld [vmem:[%s6048_s3 + $0x4] sm:$0xf]  ;;  %v3452_v47 = vld [vmem:[%s6048_s3 + $0x8] sm:$0xf0] }
  0xb9   : > { %966 = vmatmul.bf16.gmra.mxu2 %v5015_v1  ;;  %v5215_v28 = vpop.f32.mrf.mxu1 }
  0xbb   : > { %1419 = vmatpush.bf16.msra.mxu1 %v3547_v56 }
  0xbc   : > { %v5224_v52 = vpop.f32.mrf.mxu2 }
  0xbf   : > { %v5226_v53 = vpop.f32.mrf.mxu3  ;;  %v820_v54 = vpop.f32.mrf.mxu0 }
  0xc1   : > { %v5234_v57 = vpop.f32.mrf.mxu1 }
  0xc4   : > { %1050 = vmatmul.bf16.gmra.mxu3 %v4806_v32  ;;  %v5237_v58 = vpop.f32.mrf.mxu2  ;;  %v4317_v32 = vld [vmem:[%s6048_s3 + $0xb4] sm:$0xf0] }
  0xc5   : > { %v3539_v4 = vor.u32 %v4317_v32, %v3538_v2  ;;  %v3514_v2 = vld [vmem:[%s6048_s3 + $0x80] sm:$0xf]  ;;  %v4311_v32 = vld [vmem:[%s6048_s3 + $0x84] sm:$0xf0] }
  0xc7   : > { %v5239_v63 = vpop.f32.mrf.mxu3  ;;  %v822_v0 = vpop.f32.mrf.mxu0  ;;  %1420 = vmatpush.bf16.msra.mxu1 %v3539_v4  ;;  %v3515_v4 = vor.u32 %v4311_v32, %v3514_v2  ;;  %v5421_v32 = vperm.slane %v5255_v5, 1 }
  0xc9   : > { %3443 = vmatmul.msk.bf16.vlgmr.msra.gmra.mxu2 %vm780_vm1, %v4729_v60  ;;  %v5243_v3 = vpop.f32.mrf.mxu1  ;;  %v5260_v60 = vperm.slane %v5255_v5, 0 }
  0xcb   : > { %v816_v26 = vadd.f32 %v815_v29, %v5260_v60  ;;  %1421 = vmatpush.bf16.msra.mxu1 %v3531_v61  ;;  %v818_v16 = vadd.f32 %v817_v19, %v5260_v60  ;;  %v823_v11 = vadd.f32 %v822_v0, %v5260_v60  ;;  %v821_v19 = vadd.f32 %v820_v54, %v5260_v60  ;;  %v3484_v54 = vld [vmem:[%s6048_s3 + $0x48] sm:$0xf0]  ;;  %v4329_v61 = vld [vmem:[%s6048_s3 + $0x114] sm:$0xf0] }
  0xcc   : > { %v5257_v6 = vpop.f32.mrf.mxu2  ;;  %v3487_v56 = vor.u32 %v4302_v51, %v3484_v54  ;;  %v3455_v54 = vor.u32 %v4294_v46, %v3452_v47 }
  0xcd   : > { %v856_v49 = vadd.f32 %v5215_v28, %v823_v11  ;;  %v854_v30 = vadd.f32 %v5189_v22, %v821_v19  ;;  %v828_v11 = vadd.f32 %v5226_v53, %v5260_v60  ;;  %v3591_v19 = vor.u32 %v4328_v42, %v3588_v43  ;;  %v3564_v53 = vld [vmem:[%s6048_s3 + $0xe8] sm:$0xf0] }
  0xcf   : > { %v5262_v59 = vpop.f32.mrf.mxu3  ;;  %v848_v8 = vpop.f32.mrf.mxu0  ;;  %1422 = vmatpush.bf16.msra.mxu1 %v3523_v50  ;;  %v889_v28 = vadd.f32 %v5237_v58, %v856_v49  ;;  %v887_v22 = vadd.f32 %v5224_v52, %v854_v30  ;;  %v3476_v58 = vld [vmem:[%s6048_s3 + $0x38] sm:$0xf0]  ;;  %v3586_v52 = vld [vmem:[%s6048_s3 + $0x110] sm:$0xf]  ;;  %v861_v50 = vadd.f32 %v5243_v3, %v828_v11 }
  0xd0   : > { %v849_v14 = vadd.f32 %v848_v8, %v816_v26  ;;  %v4300_v8 = vld [vmem:[%s6048_s3 + $0x34] sm:$0xf] }
  0xd1   : > { %v5265_v10 = vpop.f32.mrf.mxu1  ;;  %v3479_v26 = vor.u32 %v4300_v8, %v3476_v58  ;;  %v1112_v13 = vmax.f32 %v889_v28, 0.0  ;;  %v3556_v28 = vld [vmem:[%s6048_s3 + $0xd8] sm:$0xf0] }
  0xd2   : > { %v882_v21 = vadd.f32 %v5181_v24, %v849_v14  ;;  %v3500_v24 = vld [vmem:[%s6048_s3 + $0x68] sm:$0xf0]  ;;  %v4298_v14 = vld [vmem:[%s6048_s3 + $0x24] sm:$0xf] }
  0xd3   : > { %1423 = vmatpush.bf16.msra.mxu1 %v3515_v4  ;;  %v3471_v20 = vor.u32 %v4298_v14, %v3468_v18  ;;  %v3548_v4 = vld [vmem:[%s6048_s3 + $0xc8] sm:$0xf0]  ;;  %v4314_v18 = vld [vmem:[%s6048_s3 + $0xa4] sm:$0xf] }
  0xd4   : > { %1055 = vmatmul.bf16.gmra.mxu3 %v4884_v62  ;;  %v5274_v15 = vpop.f32.mrf.mxu2  ;;  %v1103_v29 = vmax.f32 %v882_v21, 0.0 }
  0xd7   : > { %v5277_v7 = vpop.f32.mrf.mxu3  ;;  %v850_v17 = vpop.f32.mrf.mxu0  ;;  %1554 = vmatpush.bf16.msrb.mxu1 %v3591_v19 }
  0xd8   : > { %v851_v62 = vadd.f32 %v850_v17, %v818_v16  ;;  %v3587_v17 = vor.u32 %v4329_v61, %v3586_v52  ;;  %v3540_v52 = vld [vmem:[%s6048_s3 + $0xb8] sm:$0xf0] }
  0xd9   : > { %3444 = vmatmul.msk.bf16.gmra.mxu2 %vm780_vm1, %v4831_v41  ;;  %v5288_v37 = vpop.f32.mrf.mxu1  ;;  %v3503_v41 = vor.u32 %v4306_v27, %v3500_v24 }
  0xda   : > { %v884_v25 = vadd.f32 %v5198_v39, %v851_v62  ;;  %1455 = vmatpush.bf16.msrb.mxu3 %v3587_v17 }
  0xdb   : > { %1483 = vmatpush.bf16.msrb.mxu2 %v3503_v41  ;;  %v826_v41 = vadd.f32 %v5200_v40, %v5260_v60  ;;  %v4322_v40 = vld [vmem:[%s6048_s3 + $0xe4] sm:$0xf] }
  0xdc   : > { %v1106_v33 = vmax.f32 %v884_v25, 0.0  ;;  %v5298_v36 = vpop.f32.mrf.mxu2  ;;  %v3572_v25 = vld [vmem:[%s6048_s3 + $0xf8] sm:$0xf0] }
  0xdd   : > { %v3575_v24 = vor.u32 %v4324_v23, %v3572_v25  ;;  %v859_v49 = vadd.f32 %v5234_v57, %v826_v41 }
  0xde   : > { %v5301_v38 = vpack.c.bf16 %v1106_v33, %v1103_v29  ;;  %v4296_v29 = vld [vmem:[%s6048_s3 + $0x14] sm:$0xf]  ;;  %v3460_v33 = vld [vmem:[%s6048_s3 + $0x18] sm:$0xf0] }
  0xdf   : > { %v837_v34 = vpop.f32.mrf.mxu3  ;;  %1484 = vmatpush.bf16.msrb.mxu2 %v3495_v45  ;;  %1515 = vmatpush.bf16.msra.mxu0 %v3575_v24  ;;  %v3567_v45 = vor.u32 %v4322_v40, %v3564_v53  ;;  %v892_v3 = vadd.f32 %v5257_v6, %v859_v49  ;;  %v4310_v40 = vld [vmem:[%s6048_s3 + $0x84] sm:$0xf]  ;;  %v3516_v53 = vld [vmem:[%s6048_s3 + $0x88] sm:$0xf0] }
  0xe0   : > { %1391 = vmatmul.bf16.vlgmr.msrb.gmra.mxu0 %v5301_v38  ;;  %v3463_v34 = vor.u32 %v4296_v29, %v3460_v33 }
  0xe1   : > { %v5313_v31 = vpop.f32.mrf.mxu1  ;;  %v1115_v58 = vmax.f32 %v892_v3, 0.0 }
  0xe3   : > { %v5303_v39 = vpop.f32.mrf.mxu0  ;;  %1485 = vmatpush.bf16.msrb.mxu2 %v3487_v56  ;;  %1516 = vmatpush.bf16.msra.mxu0 %v3567_v45  ;;  %v4320_v56 = vld [vmem:[%s6048_s3 + $0xd4] sm:$0xf]  ;;  %v3519_v45 = vor.u32 %v4310_v40, %v3516_v53 }
  0xe4   : > { %1060 = vmatmul.bf16.gmra.mxu3 %v4962_v35  ;;  %v5330_v55 = vpop.f32.mrf.mxu2  ;;  %v3559_v57 = vor.u32 %v4320_v56, %v3556_v28 }
  0xe7   : > { %v5332_v0 = vpop.f32.mrf.mxu3  ;;  %1486 = vmatpush.bf16.msrb.mxu2 %v3479_v26  ;;  %1517 = vmatpush.bf16.msra.mxu0 %v3559_v57 }
  0xe8   : > { %v915_v6 = vadd.f32 %v5332_v0, %v5421_v32  ;;  %v833_v0 = vadd.f32 %v5262_v59, %v5260_v60 }
  0xe9   : > { %3445 = vmatmul.msk.bf16.gmra.mxu2 %vm780_vm1, %v4909_v9  ;;  %v870_v12 = vpop.f32.mrf.mxu1  ;;  %v1109_v9 = vmax.f32 %v887_v22, 0.0  ;;  %v4318_v22 = vld [vmem:[%s6048_s3 + $0xc4] sm:$0xf] }
  0xea   : > { %v3551_v8 = vor.u32 %v4318_v22, %v3548_v4  ;;  %v866_v59 = vadd.f32 %v5288_v37, %v833_v0 }
  0xeb   : > { %v5335_v35 = vpop.f32.mrf.mxu0  ;;  %v5368_v62 = vpack.c.bf16 %v1112_v13, %v1109_v9  ;;  %1487 = vmatpush.bf16.msrb.mxu2 %v3471_v20  ;;  %v831_v9 = vadd.f32 %v5239_v63, %v5260_v60  ;;  %v3532_v20 = vld [vmem:[%s6048_s3 + $0xa8] sm:$0xf0] }
  0xec   : > { %v5361_v16 = vpop.f32.mrf.mxu2  ;;  %1518 = vmatpush.bf16.msra.mxu0 %v3551_v8  ;;  %v3535_v25 = vor.u32 %v4314_v18, %v3532_v20  ;;  %v899_v41 = vadd.f32 %v5330_v55, %v866_v59 }
  0xed   : > { %v864_v63 = vadd.f32 %v5265_v10, %v831_v9 }
  0xee   : > { %v1124_v55 = vmax.f32 %v899_v41, 0.0 }
  0xef   : > { %v5366_v21 = vpop.f32.mrf.mxu3  ;;  %1488 = vmatpush.bf16.msrb.mxu2 %v3463_v34  ;;  %v4312_v34 = vld [vmem:[%s6048_s3 + $0x94] sm:$0xf]  ;;  %v897_v43 = vadd.f32 %v5298_v36, %v864_v63 }
  0xf0   : > { %1396 = vmatmul.bf16.gmra.mxu0 %v5368_v62  ;;  %v917_v23 = vadd.f32 %v5366_v21, %v5421_v32  ;;  %v3524_v21 = vld [vmem:[%s6048_s3 + $0x98] sm:$0xf0] }
  0xf1   : > { %v3527_v37 = vor.u32 %v4312_v34, %v3524_v21  ;;  %v1121_v46 = vmax.f32 %v897_v43, 0.0  ;;  %v5492_v4 = vpop.f32.mrf.mxu1 }
  0xf3   : > { %v5376_v27 = vpop.f32.mrf.mxu0  ;;  %1489 = vmatpush.bf16.msrb.mxu2 %v3455_v54 }
  0xf4   : > { %1065 = vmatmul.bf16.gmra.mxu3 %v5015_v1  ;;  %v903_v51 = vpop.f32.mrf.mxu2  ;;  %v894_v1 = vadd.f32 %v5274_v15, %v861_v50  ;;  %v5479_v50 = vpack.c.bf16 %v1124_v55, %v1121_v46 }
  0xf6   : > { %v1118_v15 = vmax.f32 %v894_v1, 0.0  ;;  %v3578_v1 = vld [vmem:[%s6048_s3 + $0x100] sm:$0xf] }
  0xf7   : > { %v919_v30 = vpop.f32.mrf.mxu3 }
  0xf8   : > { %v5433_v13 = vpack.c.bf16 %v1118_v15, %v1115_v58  ;;  %v920_v36 = vadd.f32 %v919_v30, %v5421_v32  ;;  %v4327_v30 = vld [vmem:[%s6048_s3 + $0x104] sm:$0xf0] }
  0xf9   : > { %3446 = vmatmul.msk.bf16.gmra.mxu2 %vm780_vm1, %v4985_v44  ;;  %v4316_v44 = vld [vmem:[%s6048_s3 + $0xb4] sm:$0xf]  ;;  %v3579_v28 = vor.u32 %v4327_v30, %v3578_v1  ;;  %v1015_v9 = vpop.f32.mrf.mxu1 }
  0xfa   : > { %v3543_v14 = vor.u32 %v4316_v44, %v3540_v52 }
  0xfb   : > { %v5417_v2 = vpop.f32.mrf.mxu0  ;;  %1456 = vmatpush.bf16.msrb.mxu3 %v3579_v28  ;;  %v5516_v28 = vperm.slane %v5255_v5, 2 }
  0xfc   : > { %v947_v26 = vpop.f32.mrf.mxu2  ;;  %1519 = vmatpush.bf16.msra.mxu0 %v3543_v14 }
  0xfd   : > { %v948_v17 = vadd.f32 %v947_v26, %v915_v6  ;;  %v4326_v6 = vld [vmem:[%s6048_s3 + $0x104] sm:$0xf] }
  0xff   : > { %v921_v12 = vpop.f32.mrf.mxu3  ;;  %v981_v29 = vadd.f32 %v5303_v39, %v948_v17 }
 0x100   : > { %1401 = vmatmul.bf16.gmra.mxu0 %v5433_v13 }
 0x101   : > { %1520 = vmatpush.bf16.msra.mxu0 %v3535_v25  ;;  %v1104_v39 = vmax.f32 %v981_v29, 0.0  ;;  %v1018_v59 = vpop.f32.mrf.mxu1 }
 0x103   : > { %v5441_v61 = vpop.f32.mrf.mxu0 }
 0x104   : > { %v949_v24 = vpop.f32.mrf.mxu2 }
 0x105   : > { %v950_v33 = vadd.f32 %v949_v24, %v917_v23  ;;  %1521 = vmatpush.bf16.msra.mxu0 %v3527_v37 }
 0x107   : > { %v924_v11 = vpop.f32.mrf.mxu3  ;;  %v983_v10 = vadd.f32 %v5335_v35, %v950_v33 }
 0x109   : > { %v1107_v19 = vmax.f32 %v983_v10, 0.0  ;;  %3447 = vmatmul.msk.bf16.gmra.mxu2 %vm780_vm1, %v5021_v48  ;;  %1522 = vmatpush.bf16.msra.mxu0 %v3519_v45  ;;  %v836_v48 = vadd.f32 %v5277_v7, %v5260_v60  ;;  %v922_v60 = vadd.f32 %v921_v12, %v5421_v32  ;;  %v1020_v37 = vpop.f32.mrf.mxu1 }
 0x10b   : > { %v992_v42 = vpop.f32.mrf.mxu0  ;;  %v1131_v35 = vpack.c.bf16 %v1107_v19, %v1104_v39  ;;  %v869_v56 = vadd.f32 %v5313_v31, %v836_v48 }
 0x10c   : > { %v952_v47 = vpop.f32.mrf.mxu2 }
 0x10d   : > { %1424 = vmatmul.bf16.vlgmr.msra.gmra.mxu1 %v1131_v35  ;;  %v953_v54 = vadd.f32 %v952_v47, %v920_v36  ;;  %v902_v15 = vadd.f32 %v5361_v16, %v869_v56 }
 0x10f   : > { %v926_v49 = vpop.f32.mrf.mxu3  ;;  %v986_v57 = vadd.f32 %v5376_v27, %v953_v54  ;;  %v3580_v27 = vld [vmem:[%s6048_s3 + $0x108] sm:$0xf0]  ;;  %v1127_v12 = vmax.f32 %v902_v15, 0.0 }
 0x110   : > { %1406 = vmatmul.bf16.gmra.mxu0 %v5479_v50  ;;  %v3583_v16 = vor.u32 %v4326_v6, %v3580_v27  ;;  %v927_v18 = vadd.f32 %v926_v49, %v5421_v32 }
 0x111   : > { %v1110_v26 = vmax.f32 %v986_v57, 0.0  ;;  %v5503_v14 = vpack.c.bf16 %v1127_v12, %v1127_v12  ;;  %v1023_v40 = vpop.f32.mrf.mxu1  ;;  %v1019_v12 = vadd.f32 %v1018_v59, %v5516_v28 }
 0x112   : > { %1555 = vmatpush.bf16.msrb.mxu1 %v3583_v16 }
 0x113   : > { %v995_v51 = vpop.f32.mrf.mxu0 }
 0x114   : > { %v954_v7 = vpop.f32.mrf.mxu2 }
 0x115   : > { %v955_v3 = vadd.f32 %v954_v7, %v922_v60  ;;  %v1014_v60 = vadd.f32 %v5492_v4, %v5516_v28 }
 0x117   : > { %v929_v22 = vpop.f32.mrf.mxu3  ;;  %v988_v8 = vadd.f32 %v5417_v2, %v955_v3  ;;  %v925_v2 = vadd.f32 %v924_v11, %v5421_v32  ;;  %v1016_v3 = vadd.f32 %v1015_v9, %v5516_v28 }
 0x118   : > { %v930_v21 = vadd.f32 %v929_v22, %v5421_v32 }
 0x119   : > { %1490 = vmatmul.bf16.vlgmr.msrb.gmra.mxu2 %v5301_v38  ;;  %v1113_v31 = vmax.f32 %v988_v8, 0.0 }
 0x11b   : > { %v997_v58 = vpop.f32.mrf.mxu0  ;;  %v1134_v44 = vpack.c.bf16 %v1113_v31, %v1110_v26 }
 0x11c   : > { %v957_v52 = vpop.f32.mrf.mxu2 }
 0x11d   : > { %1429 = vmatmul.bf16.gmra.mxu1 %v1134_v44  ;;  %v958_v17 = vadd.f32 %v957_v52, %v925_v2  ;;  %v1021_v2 = vadd.f32 %v1020_v37, %v5516_v28 }
 0x11f   : > { %v931_v38 = vpop.f32.mrf.mxu3  ;;  %v991_v23 = vadd.f32 %v5441_v61, %v958_v17 }
 0x120   : > { %1411 = vmatmul.bf16.gmra.mxu0 %v5503_v14  ;;  %v932_v61 = vadd.f32 %v931_v38, %v5421_v32 }
 0x121   : > { %v1116_v33 = vmax.f32 %v991_v23, 0.0 }
 0x123   : > { %v1000_v0 = vpop.f32.mrf.mxu0 }
 0x124   : > { %v959_v20 = vpop.f32.mrf.mxu2 }
 0x125   : > { %v960_v25 = vadd.f32 %v959_v20, %v927_v18 }
 0x127   : > { %v934_v63 = vpop.f32.mrf.mxu3  ;;  %v993_v24 = vadd.f32 %v992_v42, %v960_v25 }
 0x128   : > { %v935_v46 = vadd.f32 %v934_v63, %v5421_v32 }
 0x129   : > { %1495 = vmatmul.bf16.gmra.mxu2 %v5368_v62  ;;  %v1119_v41 = vmax.f32 %v993_v24, 0.0  ;;  %v1024_v24 = vadd.f32 %v1023_v40, %v5516_v28 }
 0x12b   : > { %v1002_v29 = vpop.f32.mrf.mxu0  ;;  %v1137_v11 = vpack.c.bf16 %v1119_v41, %v1116_v33 }
 0x12c   : > { %v962_v34 = vpop.f32.mrf.mxu2 }
 0x12d   : > { %1434 = vmatmul.bf16.gmra.mxu1 %v1137_v11  ;;  %v963_v43 = vadd.f32 %v962_v34, %v930_v21 }
 0x12f   : > { %v936_v10 = vpop.f32.mrf.mxu3  ;;  %v996_v19 = vadd.f32 %v995_v51, %v963_v43 }
 0x130   : > { %1523 = vmatmul.bf16.vlgmr.msra.gmra.mxu0 %v1131_v35  ;;  %v1025_v35 = vpop.f32.mrf.mxu1 }
 0x131   : > { %v1122_v45 = vmax.f32 %v996_v19, 0.0  ;;  %v1026_v41 = vadd.f32 %v1025_v35, %v5516_v28 }
 0x134   : > { %v964_v39 = vpop.f32.mrf.mxu2 }
 0x135   : > { %v965_v55 = vadd.f32 %v964_v39, %v932_v61 }
 0x137   : > { %v1046_v42 = vpop.f32.mrf.mxu3  ;;  %v998_v53 = vadd.f32 %v997_v58, %v965_v55 }
 0x138   : > { %v5513_v30 = vpop.f32.mrf.mxu1  ;;  %v1047_v15 = vadd.f32 %v1046_v42, %v1014_v60 }
 0x139   : > { %v1125_v62 = vmax.f32 %v998_v53, 0.0  ;;  %1500 = vmatmul.bf16.gmra.mxu2 %v5433_v13  ;;  %v1029_v40 = vadd.f32 %v5513_v30, %v5516_v28 }
 0x13b   : > { %v1140_v47 = vpack.c.bf16 %v1125_v62, %v1122_v45 }
 0x13c   : > { %v967_v36 = vpop.f32.mrf.mxu2 }
 0x13d   : > { %1439 = vmatmul.bf16.gmra.mxu1 %v1140_v47  ;;  %v968_v49 = vadd.f32 %v967_v36, %v935_v46 }
 0x13f   : > { %v1048_v48 = vpop.f32.mrf.mxu3  ;;  %v1001_v54 = vadd.f32 %v1000_v0, %v968_v49 }
 0x140   : > { %1528 = vmatmul.bf16.gmra.mxu0 %v1134_v44  ;;  %v1030_v57 = vpop.f32.mrf.mxu1  ;;  %v1049_v22 = vadd.f32 %v1048_v48, %v1016_v3 }
 0x141   : > { %v1128_v56 = vmax.f32 %v1001_v54, 0.0  ;;  %v1031_v62 = vadd.f32 %v1030_v57, %v5516_v28 }
 0x143   : > { %v1143_v13 = vpack.c.bf16 %v1128_v56, %v1128_v56 }
 0x144   : > { %v969_v1 = vpop.f32.mrf.mxu2 }
 0x147   : > { %v1051_v51 = vpop.f32.mrf.mxu3 }
 0x148   : > { %v5522_v31 = vpop.f32.mrf.mxu1  ;;  %v1052_v38 = vadd.f32 %v1051_v51, %v1019_v12 }
 0x149   : > { %1505 = vmatmul.bf16.gmra.mxu2 %v5479_v50  ;;  %v1034_v60 = vadd.f32 %v5522_v31, %v5516_v28 }
 0x14c   : > { %v1079_v32 = vpop.f32.mrf.mxu2 }
 0x14d   : > { %1444 = vmatmul.bf16.gmra.mxu1 %v1143_v13  ;;  %v1080_v8 = vadd.f32 %v1079_v32, %v1047_v15 }
 0x14f   : > { %v1053_v7 = vpop.f32.mrf.mxu3  ;;  %v1105_v50 = vmax.f32 %v1080_v8, 0.0 }
 0x150   : > { %1533 = vmatmul.bf16.gmra.mxu0 %v1137_v11  ;;  %v1035_v52 = vpop.f32.mrf.mxu1  ;;  %v1054_v9 = vadd.f32 %v1053_v7, %v1021_v2 }
 0x154   : > { %v1081_v58 = vpop.f32.mrf.mxu2 }
 0x155   : > { %v1082_v26 = vadd.f32 %v1081_v58, %v1049_v22 }
 0x157   : > { %v1056_v5 = vpop.f32.mrf.mxu3  ;;  %v1108_v6 = vmax.f32 %v1082_v26, 0.0 }
 0x158   : > { %v1057_v11 = vadd.f32 %v1056_v5, %v1024_v24 }
 0x159   : > { %v1132_v27 = vpack.c.bf16 %v1108_v6, %v1105_v50  ;;  %1510 = vmatmul.bf16.gmra.mxu2 %v5503_v14 }
 0x15b   : > { %3592 = vmatmul.msk.bf16.vlgmr.msrb.gmra.mxu3 %vm1367_vm2, %v1132_v27 }
 0x15c   : > { %v1084_v4 = vpop.f32.mrf.mxu2 }
 0x15d   : > { %v1392_v16 = vpop.f32.mrf.mxu0  ;;  %3597 = vmatmul.msk.bf16.vlgmr.msrb.gmra.mxu1 %vm1367_vm2, %v1132_v27  ;;  %v1085_v0 = vadd.f32 %v1084_v4, %v1052_v38 }
 0x15f   : > { %v1058_v44 = vpop.f32.mrf.mxu3  ;;  %v1111_v23 = vmax.f32 %v1085_v0, 0.0 }
 0x160   : > { %1538 = vmatmul.bf16.gmra.mxu0 %v1140_v47  ;;  %v1059_v34 = vadd.f32 %v1058_v44, %v1026_v41  ;;  %v5541_v47 = vld [vmem:[%s6051_s6 + $0x3] sm:$0x3] }
 0x161   : > { %v1183_v49 = vperm.slane %v5541_v47, 0 }
 0x163   : > { %v1393_v56 = vadd.f32 %v1392_v16, %v1183_v49 }
 0x164   : > { %v1086_v17 = vpop.f32.mrf.mxu2 }
 0x165   : > { %v1087_v18 = vadd.f32 %v1086_v17, %v1054_v9  ;;  %v1394_v20 = vpop.f32.mrf.mxu0 }
 0x166   : > { %v1395_v22 = vadd.f32 %v1394_v20, %v1183_v49 }
 0x167   : > { %v1061_v14 = vpop.f32.mrf.mxu3  ;;  %v1114_v25 = vmax.f32 %v1087_v18, 0.0 }
 0x168   : > { %v1062_v46 = vadd.f32 %v1061_v14, %v1029_v40 }
 0x169   : > { %v1135_v63 = vpack.c.bf16 %v1114_v25, %v1111_v23 }
 0x16b   : > { %3593 = vmatmul.msk.bf16.gmra.mxu3 %vm1367_vm2, %v1135_v63 }
 0x16c   : > { %v1089_v59 = vpop.f32.mrf.mxu2 }
 0x16d   : > { %v1397_v29 = vpop.f32.mrf.mxu0  ;;  %3598 = vmatmul.msk.bf16.gmra.mxu1 %vm1367_vm2, %v1135_v63  ;;  %v1090_v21 = vadd.f32 %v1089_v59, %v1057_v11 }
 0x16e   : > { %v1398_v27 = vadd.f32 %v1397_v29, %v1183_v49 }
 0x16f   : > { %v1063_v33 = vpop.f32.mrf.mxu3  ;;  %v1117_v39 = vmax.f32 %v1090_v21, 0.0 }
 0x170   : > { %1543 = vmatmul.bf16.gmra.mxu0 %v1143_v13  ;;  %v1064_v36 = vadd.f32 %v1063_v33, %v1031_v62 }
 0x174   : > { %v1091_v10 = vpop.f32.mrf.mxu2 }
 0x175   : > { %v1092_v37 = vadd.f32 %v1091_v10, %v1059_v34  ;;  %v1399_v43 = vpop.f32.mrf.mxu0 }
 0x176   : > { %v1400_v52 = vadd.f32 %v1399_v43, %v1183_v49 }
 0x177   : > { %v1066_v61 = vpop.f32.mrf.mxu3  ;;  %v1120_v19 = vmax.f32 %v1092_v37, 0.0 }
 0x178   : > { %v1067_v15 = vadd.f32 %v1066_v61, %v1034_v60 }
 0x179   : > { %v1138_v55 = vpack.c.bf16 %v1120_v19, %v1117_v39 }
 0x17b   : > { %3594 = vmatmul.msk.bf16.gmra.mxu3 %vm1367_vm2, %v1138_v55 }
 0x17c   : > { %v1094_v42 = vpop.f32.mrf.mxu2 }
 0x17d   : > { %v1402_v53 = vpop.f32.mrf.mxu0  ;;  %3599 = vmatmul.msk.bf16.gmra.mxu1 %vm1367_vm2, %v1138_v55  ;;  %v1095_v48 = vadd.f32 %v1094_v42, %v1062_v46 }
 0x17e   : > { %v1403_v17 = vadd.f32 %v1402_v53, %v1183_v49 }
 0x17f   : > { %v1068_v45 = vpop.f32.mrf.mxu3  ;;  %v1123_v51 = vmax.f32 %v1095_v48, 0.0 }
 0x180   : > { %v5571_v45 = vperm.slane %v5541_v47, 1 }
 0x184   : > { %v1096_v35 = vpop.f32.mrf.mxu2 }
 0x185   : > { %v1097_v54 = vadd.f32 %v1096_v35, %v1064_v36  ;;  %v1404_v1 = vpop.f32.mrf.mxu0 }
 0x186   : > { %v1405_v25 = vadd.f32 %v1404_v1, %v1183_v49 }
 0x187   : > { %v1126_v30 = vmax.f32 %v1097_v54, 0.0 }
 0x189   : > { %v1141_v13 = vpack.c.bf16 %v1126_v30, %v1123_v51 }
 0x18a   : > { %v1425_v32 = vpop.f32.mrf.mxu1 }
 0x18b   : > { %v5546_v7 = vadd.f32 %v1425_v32, %v1393_v56  ;;  %3595 = vmatmul.msk.bf16.gmra.mxu3 %vm1367_vm2, %v1141_v13 }
 0x18c   : > { %v1099_v57 = vpop.f32.mrf.mxu2 }
 0x18d   : > { %v1407_v3 = vpop.f32.mrf.mxu0  ;;  %3600 = vmatmul.msk.bf16.gmra.mxu1 %vm1367_vm2, %v1141_v13  ;;  %v1100_v8 = vadd.f32 %v1099_v57, %v1067_v15 }
 0x18e   : > { %v1408_v33 = vadd.f32 %v1407_v3, %v1183_v49 }
 0x18f   : > { %v1129_v50 = vmax.f32 %v1100_v8, 0.0 }
 0x191   : > { %v1144_v4 = vpack.c.bf16 %v1129_v50, %v1129_v50 }
 0x192   : > { %v1427_v58 = vpop.f32.mrf.mxu1 }
 0x193   : > { %v5550_v26 = vadd.f32 %v1427_v58, %v1395_v22 }
 0x194   : > { %v1101_v5 = vpop.f32.mrf.mxu2 }
 0x195   : > { %v1409_v6 = vpop.f32.mrf.mxu0 }
 0x196   : > { %v1410_v10 = vadd.f32 %v1409_v6, %v1183_v49 }
 0x19a   : > { %v1430_v28 = vpop.f32.mrf.mxu1 }
 0x19b   : > { %v5552_v31 = vadd.f32 %v1430_v28, %v1398_v27  ;;  %3596 = vmatmul.msk.bf16.gmra.mxu3 %vm1367_vm2, %v1144_v4 }
 0x19c   : > { %v1491_v12 = vpop.f32.mrf.mxu2 }
 0x19d   : > { %v1412_v16 = vpop.f32.mrf.mxu0  ;;  %3601 = vmatmul.msk.bf16.gmra.mxu1 %vm1367_vm2, %v1144_v4  ;;  %v1492_v36 = vadd.f32 %v1491_v12, %v5571_v45 }
 0x19e   : > { %v1413_v44 = vadd.f32 %v1412_v16, %v1183_v49 }
 0x1a2   : > { %v1432_v2 = vpop.f32.mrf.mxu1 }
 0x1a3   : > { %v5556_v38 = vadd.f32 %v1432_v2, %v1400_v52 }
 0x1a4   : > { %v1493_v9 = vpop.f32.mrf.mxu2 }
 0x1a5   : > { %v1414_v0 = vpop.f32.mrf.mxu0  ;;  %v1494_v56 = vadd.f32 %v1493_v9, %v5571_v45 }
 0x1aa   : > { %v1435_v18 = vpop.f32.mrf.mxu1 }
 0x1ab   : > { %v5558_v20 = vadd.f32 %v1435_v18, %v1403_v17 }
 0x1ac   : > { %v1496_v14 = vpop.f32.mrf.mxu2 }
 0x1ad   : > { %v1524_v23 = vpop.f32.mrf.mxu0  ;;  %v1497_v58 = vadd.f32 %v1496_v14, %v5571_v45 }
 0x1ae   : > { %v1525_v48 = vadd.f32 %v1524_v23, %v1492_v36 }
 0x1b2   : > { %v1437_v63 = vpop.f32.mrf.mxu1 }
 0x1b3   : > { %v5560_v59 = vadd.f32 %v1437_v63, %v1405_v25 }
 0x1b4   : > { %v1498_v24 = vpop.f32.mrf.mxu2 }
 0x1b5   : > { %v1526_v29 = vpop.f32.mrf.mxu0  ;;  %v1499_v16 = vadd.f32 %v1498_v24, %v5571_v45 }
 0x1b6   : > { %v1527_v47 = vadd.f32 %v1526_v29, %v1494_v56 }
 0x1ba   : > { %v1440_v41 = vpop.f32.mrf.mxu1 }
 0x1bb   : > { %v5562_v11 = vadd.f32 %v1440_v41, %v1408_v33 }
 0x1bc   : > { %v1501_v34 = vpop.f32.mrf.mxu2 }
 0x1bd   : > { %v1529_v21 = vpop.f32.mrf.mxu0  ;;  %v1502_v14 = vadd.f32 %v1501_v34, %v5571_v45 }
 0x1be   : > { %v1530_v50 = vadd.f32 %v1529_v21, %v1497_v58 }
 0x1c2   : > { %v1442_v37 = vpop.f32.mrf.mxu1 }
 0x1c3   : > { %v5564_v43 = vadd.f32 %v1442_v37, %v1410_v10 }
 0x1c4   : > { %v1503_v61 = vpop.f32.mrf.mxu2 }
 0x1c5   : > { %v1531_v39 = vpop.f32.mrf.mxu0  ;;  %v1504_v41 = vadd.f32 %v1503_v61, %v5571_v45 }
 0x1c6   : > { %v1532_v52 = vadd.f32 %v1531_v39, %v1499_v16 }
 0x1ca   : > { %v1445_v19 = vpop.f32.mrf.mxu1 }
 0x1cb   : > { %v5566_v55 = vadd.f32 %v1445_v19, %v1413_v44 }
 0x1cc   : > { %v5568_v42 = vpop.f32.mrf.mxu2 }
 0x1cd   : > { %v1534_v40 = vpop.f32.mrf.mxu0 }
 0x1ce   : > { %v1535_v25 = vadd.f32 %v1534_v40, %v1502_v14  ;;  %v1507_v40 = vadd.f32 %v5568_v42, %v5571_v45 }
 0x1d2   : > { %v1447_v53 = vpop.f32.mrf.mxu1 }
 0x1d4   : > { %v5573_v62 = vpop.f32.mrf.mxu2 }
 0x1d5   : > { %v1536_v46 = vpop.f32.mrf.mxu0 }
 0x1d6   : > { %v1537_v10 = vadd.f32 %v1536_v46, %v1504_v41 }
 0x1da   : > { %v1557_v35 = vpop.f32.mrf.mxu1 }
 0x1db   : > { %v1558_v49 = vadd.f32 %v1557_v35, %v1525_v48 }
 0x1dc   : > { %v5576_v54 = vpop.f32.mrf.mxu2 }
 0x1dd   : > { %v1582_v1 = vmax.f32 %v1558_v49, 0.0  ;;  %v1539_v51 = vpop.f32.mrf.mxu0 }
 0x1de   : > { %v1458_v30 = vpop.f32.mrf.mxu3  ;;  %v1540_v61 = vadd.f32 %v1539_v51, %v1507_v40 }
 0x1df   : > { %1600 = vst [vmem:[#allocation2 + $0x8] sm:$0xff] %v1582_v1  ;;  %v1459_v13 = vadd.f32 %v1458_v30, %v5546_v7  ;;  %v1509_v1 = vadd.f32 %v5573_v62, %v5571_v45 }
 0x1e1   : > { %v1581_v32 = vmax.f32 %v1459_v13, 0.0 }
 0x1e2   : > { %v1559_v60 = vpop.f32.mrf.mxu1 }
 0x1e3   : > { %1599 = vst [vmem:[#allocation2] sm:$0xff] %v1581_v32  ;;  %v1560_v57 = vadd.f32 %v1559_v60, %v1527_v47  ;;  %v1512_v32 = vadd.f32 %v5576_v54, %v5571_v45 }
 0x1e4   : > { %v1513_v3 = vpop.f32.mrf.mxu2 }
 0x1e5   : > { %v1584_v15 = vmax.f32 %v1560_v57, 0.0  ;;  %v1541_v22 = vpop.f32.mrf.mxu0 }
 0x1e6   : > { %v1460_v8 = vpop.f32.mrf.mxu3  ;;  %v1542_v42 = vadd.f32 %v1541_v22, %v1509_v1 }
 0x1e7   : > { %1602 = vst [vmem:[#allocation2 + $0x18] sm:$0xff] %v1584_v15  ;;  %v1461_v5 = vadd.f32 %v1460_v8, %v5550_v26 }
 0x1e9   : > { %v1583_v6 = vmax.f32 %v1461_v5, 0.0 }
 0x1ea   : > { %v1562_v27 = vpop.f32.mrf.mxu1 }
 0x1eb   : > { %1601 = vst [vmem:[#allocation2 + $0x10] sm:$0xff] %v1583_v6  ;;  %v1563_v4 = vadd.f32 %v1562_v27, %v1530_v50 }
 0x1ed   : > { %v1586_v7 = vmax.f32 %v1563_v4, 0.0  ;;  %v1544_v28 = vpop.f32.mrf.mxu0 }
 0x1ee   : > { %v1463_v12 = vpop.f32.mrf.mxu3  ;;  %v1545_v57 = vadd.f32 %v1544_v28, %v1512_v32 }
 0x1ef   : > { %1604 = vst [vmem:[#allocation2 + $0x28] sm:$0xff] %v1586_v7  ;;  %v1464_v44 = vadd.f32 %v1463_v12, %v5552_v31 }
 0x1f1   : > { %v1585_v2 = vmax.f32 %v1464_v44, 0.0 }
 0x1f2   : > { %v1564_v9 = vpop.f32.mrf.mxu1 }
 0x1f3   : > { %1603 = vst [vmem:[#allocation2 + $0x20] sm:$0xff] %v1585_v2  ;;  %v1565_v0 = vadd.f32 %v1564_v9, %v1532_v52 }
 0x1f5   : > { %v1588_v17 = vmax.f32 %v1565_v0, 0.0  ;;  %v1546_v26 = vpop.f32.mrf.mxu0 }
 0x1f6   : > { %v1465_v18 = vpop.f32.mrf.mxu3 }
 0x1f7   : > { %1606 = vst [vmem:[#allocation2 + $0x38] sm:$0xff] %v1588_v17  ;;  %v1466_v23 = vadd.f32 %v1465_v18, %v5556_v38  ;;  %v4527_v38 = vmov 0.0  }
 0x1f8   : > { %1617 = vst [vmem:[#allocation3 + $0x10] sm:$0xff] %v4527_v38 }
 0x1f9   : > { %v1587_v63 = vmax.f32 %v1466_v23, 0.0  ;;  %1618 = vst [vmem:[#allocation3] sm:$0xff] %v4527_v38 }
 0x1fa   : > { %v1567_v29 = vpop.f32.mrf.mxu1  ;;  %1619 = vst [vmem:[#allocation3 + $0x18] sm:$0xff] %v4527_v38 }
 0x1fb   : > { %1605 = vst [vmem:[#allocation2 + $0x30] sm:$0xff] %v1587_v63  ;;  %v1568_v24 = vadd.f32 %v1567_v29, %v1535_v25 }
 0x1fc   : > { %1620 = vst [vmem:[#allocation3 + $0x8] sm:$0xff] %v4527_v38 }
 0x1fd   : > { %v1590_v33 = vmax.f32 %v1568_v24, 0.0 }
 0x1fe   : > { %v1468_v31 = vpop.f32.mrf.mxu3 }
 0x1ff   : > { %1608 = vst [vmem:[#allocation2 + $0x48] sm:$0xff] %v1590_v33  ;;  %v1469_v21 = vadd.f32 %v1468_v31, %v5558_v20 }
 0x201   : > { %v1589_v37 = vmax.f32 %v1469_v21, 0.0 }
 0x202   : > { %v1569_v39 = vpop.f32.mrf.mxu1 }
 0x203   : > { %1607 = vst [vmem:[#allocation2 + $0x40] sm:$0xff] %v1589_v37  ;;  %v1570_v34 = vadd.f32 %v1569_v39, %v1537_v10 }
 0x205   : > { %v1592_v19 = vmax.f32 %v1570_v34, 0.0 }
 0x206   : > { %v1470_v53 = vpop.f32.mrf.mxu3 }
 0x207   : > { %1610 = vst [vmem:[#allocation2 + $0x58] sm:$0xff] %v1592_v19  ;;  %v1471_v36 = vadd.f32 %v1470_v53, %v5560_v59 }
 0x209   : > { %v1591_v48 = vmax.f32 %v1471_v36, 0.0 }
 0x20a   : > { %v1572_v20 = vpop.f32.mrf.mxu1 }
 0x20b   : > { %1609 = vst [vmem:[#allocation2 + $0x50] sm:$0xff] %v1591_v48  ;;  %v1573_v46 = vadd.f32 %v1572_v20, %v1540_v61 }
 0x20d   : > { %v1594_v35 = vmax.f32 %v1573_v46, 0.0 }
 0x20e   : > { %v1473_v49 = vpop.f32.mrf.mxu3 }
 0x20f   : > { %1612 = vst [vmem:[#allocation2 + $0x68] sm:$0xff] %v1594_v35  ;;  %v1474_v30 = vadd.f32 %v1473_v49, %v5562_v11 }
 0x211   : > { %v1593_v56 = vmax.f32 %v1474_v30, 0.0 }
 0x212   : > { %v1574_v13 = vpop.f32.mrf.mxu1 }
 0x213   : > { %1611 = vst [vmem:[#allocation2 + $0x60] sm:$0xff] %v1593_v56  ;;  %v1575_v59 = vadd.f32 %v1574_v13, %v1542_v42 }
 0x215   : > { %v1596_v51 = vmax.f32 %v1575_v59, 0.0 }
 0x216   : > { %v1475_v47 = vpop.f32.mrf.mxu3 }
 0x217   : > { %1614 = vst [vmem:[#allocation2 + $0x78] sm:$0xff] %v1596_v51  ;;  %v1476_v60 = vadd.f32 %v1475_v47, %v5564_v43 }
 0x219   : > { %v1595_v3 = vmax.f32 %v1476_v60, 0.0 }
 0x21a   : > { %v1577_v15 = vpop.f32.mrf.mxu1 }
 0x21b   : > { %1613 = vst [vmem:[#allocation2 + $0x70] sm:$0xff] %v1595_v3  ;;  %v1578_v62 = vadd.f32 %v1577_v15, %v1545_v57 }
 0x21d   : > { %v1598_v8 = vmax.f32 %v1578_v62, 0.0 }
 0x21e   : > { %v1478_v11 = vpop.f32.mrf.mxu3 }
 0x21f   : > { %1616 = vst [vmem:[#allocation2 + $0x88] sm:$0xff] %v1598_v8  ;;  %v1479_v22 = vadd.f32 %v1478_v11, %v5566_v55 }
 0x221   : > { %v1597_v58 = vmax.f32 %v1479_v22, 0.0 }
 0x222   : > { %v1579_v5 = vpop.f32.mrf.mxu1 }
 0x223   : > { %1615 = vst [vmem:[#allocation2 + $0x80] sm:$0xff] %v1597_v58 }
 0x226   : > { %v1480_v50 = vpop.f32.mrf.mxu3 }
 0x227 PF: > { %v3719_v43 = vld [vmem:[%s4584_s30 + $0xe0] sm:$0xf]  ;;  %v4361_v45 = vld [vmem:[%s4584_s30 + $0xec] sm:$0xf0]  ;;  %v4359_v27 = vld [vmem:[%s4584_s30 + $0xe4] sm:$0xf] }
 0x228   : > { %v3847_v55 = vld [vmem:[%s4584_s30 + $0x1e0] sm:$0xf]  ;;  %v3720_v54 = vor.u32 %v4361_v45, %v3719_v43  ;;  %v4393_v6 = vld [vmem:[%s4584_s30 + $0x1ec] sm:$0xf0]  ;;  %v3721_v4 = vld [vmem:[%s4584_s30 + $0xf0] sm:$0xf0] }
 0x229   : > { %v3848_v7 = vor.u32 %v4393_v6, %v3847_v55  ;;  %v3724_v28 = vor.u32 %v4359_v27, %v3721_v4  ;;  %v4391_v12 = vld [vmem:[%s4584_s30 + $0x1e4] sm:$0xf]  ;;  %v3849_v16 = vld [vmem:[%s4584_s30 + $0x1f0] sm:$0xf0]  ;;  %v3703_v44 = vld [vmem:[%s4584_s30 + $0xc0] sm:$0xf] }
 0x22a   : > { %2019 = vmatpush.bf16.msra.mxu0 %v3720_v54  ;;  %v3852_v52 = vor.u32 %v4391_v12, %v3849_v16  ;;  %v4357_v2 = vld [vmem:[%s4584_s30 + $0xcc] sm:$0xf0]  ;;  %v3831_v9 = vld [vmem:[%s4584_s30 + $0x1c0] sm:$0xf]  ;;  %v4355_v18 = vld [vmem:[%s4584_s30 + $0xc4] sm:$0xf] }
 0x22b   : > { %v4389_v0 = vld [vmem:[%s4584_s30 + $0x1cc] sm:$0xf0]  ;;  %2032 = vmatpush.bf16.msra.mxu1 %v3848_v7  ;;  %2045 = vmatpush.bf16.msra.mxu2 %v3724_v28  ;;  %v3704_v17 = vor.u32 %v4357_v2, %v3703_v44  ;;  %v3705_v14 = vld [vmem:[%s4584_s30 + $0xd0] sm:$0xf0]  ;;  %v4387_v23 = vld [vmem:[%s4584_s30 + $0x1c4] sm:$0xf] }
 0x22c   : > { %v3832_v26 = vor.u32 %v4389_v0, %v3831_v9  ;;  %2058 = vmatpush.bf16.msra.mxu3 %v3852_v52  ;;  %v3708_v25 = vor.u32 %v4355_v18, %v3705_v14  ;;  %v3833_v63 = vld [vmem:[%s4584_s30 + $0x1d0] sm:$0xf0]  ;;  %v3687_v29 = vld [vmem:[%s4584_s30 + $0xa0] sm:$0xf]  ;;  %v4353_v24 = vld [vmem:[%s4584_s30 + $0xac] sm:$0xf0] }
 0x22d   : > { %v3836_v33 = vor.u32 %v4387_v23, %v3833_v63  ;;  %v3815_v31 = vld [vmem:[%s4584_s30 + $0x1a0] sm:$0xf]  ;;  %v4385_v41 = vld [vmem:[%s4584_s30 + $0x1ac] sm:$0xf0]  ;;  %v4351_v21 = vld [vmem:[%s4584_s30 + $0xa4] sm:$0xf]  ;;  %v3688_v10 = vor.u32 %v4353_v24, %v3687_v29 }
 0x22e   : > { %2020 = vmatpush.bf16.msra.mxu0 %v3704_v17  ;;  %v3689_v37 = vld [vmem:[%s4584_s30 + $0xb0] sm:$0xf0]  ;;  %v4383_v39 = vld [vmem:[%s4584_s30 + $0x1a4] sm:$0xf]  ;;  %v3816_v19 = vor.u32 %v4385_v41, %v3815_v31  ;;  %v3671_v38 = vld [vmem:[%s4584_s30 + $0x80] sm:$0xf] }
 0x22f   : > { %v3817_v34 = vld [vmem:[%s4584_s30 + $0x1b0] sm:$0xf0]  ;;  %2033 = vmatpush.bf16.msra.mxu1 %v3832_v26  ;;  %2046 = vmatpush.bf16.msra.mxu2 %v3708_v25  ;;  %v3692_v53 = vor.u32 %v4351_v21, %v3689_v37  ;;  %v4349_v40 = vld [vmem:[%s4584_s30 + $0x8c] sm:$0xf0]  ;;  %v3799_v36 = vld [vmem:[%s4584_s30 + $0x180] sm:$0xf] }
 0x230   : > { %2059 = vmatpush.bf16.msra.mxu3 %v3836_v33  ;;  %v3820_v61 = vor.u32 %v4383_v39, %v3817_v34  ;;  %v4381_v48 = vld [vmem:[%s4584_s30 + $0x18c] sm:$0xf0]  ;;  %v4347_v20 = vld [vmem:[%s4584_s30 + $0x84] sm:$0xf]  ;;  %v3673_v46 = vld [vmem:[%s4584_s30 + $0x90] sm:$0xf0]  ;;  %v3672_v1 = vor.u32 %v4349_v40, %v3671_v38 }
 0x231   : > { %v4379_v35 = vld [vmem:[%s4584_s30 + $0x184] sm:$0xf]  ;;  %v3801_v49 = vld [vmem:[%s4584_s30 + $0x190] sm:$0xf0]  ;;  %v3800_v30 = vor.u32 %v4381_v48, %v3799_v36  ;;  %v3676_v42 = vor.u32 %v4347_v20, %v3673_v46  ;;  %v3655_v56 = vld [vmem:[%s4584_s30 + $0x60] sm:$0xf] }
 0x232   : > { %2021 = vmatpush.bf16.msra.mxu0 %v3688_v10  ;;  %v4345_v13 = vld [vmem:[%s4584_s30 + $0x6c] sm:$0xf0]  ;;  %v3783_v59 = vld [vmem:[%s4584_s30 + $0x160] sm:$0xf]  ;;  %v3804_v51 = vor.u32 %v4379_v35, %v3801_v49  ;;  %v4343_v32 = vld [vmem:[%s4584_s30 + $0x64] sm:$0xf] }
 0x233   : > { %2034 = vmatpush.bf16.msra.mxu1 %v3816_v19  ;;  %2047 = vmatpush.bf16.msra.mxu2 %v3692_v53  ;;  %v4377_v47 = vld [vmem:[%s4584_s30 + $0x16c] sm:$0xf0]  ;;  %v3657_v60 = vld [vmem:[%s4584_s30 + $0x70] sm:$0xf0]  ;;  %v4375_v57 = vld [vmem:[%s4584_s30 + $0x164] sm:$0xf]  ;;  %v3656_v15 = vor.u32 %v4345_v13, %v3655_v56 }
 0x234   : > { %2060 = vmatpush.bf16.msra.mxu3 %v3820_v61  ;;  %v3785_v3 = vld [vmem:[%s4584_s30 + $0x170] sm:$0xf0]  ;;  %v3784_v62 = vor.u32 %v4377_v47, %v3783_v59  ;;  %v3660_v8 = vor.u32 %v4343_v32, %v3657_v60  ;;  %v3639_v11 = vld [vmem:[%s4584_s30 + $0x40] sm:$0xf]  ;;  %v4341_v22 = vld [vmem:[%s4584_s30 + $0x4c] sm:$0xf0] }
 0x235   : > { %v3767_v58 = vld [vmem:[%s4584_s30 + $0x140] sm:$0xf]  ;;  %v3788_v5 = vor.u32 %v4375_v57, %v3785_v3  ;;  %v4373_v50 = vld [vmem:[%s4584_s30 + $0x14c] sm:$0xf0]  ;;  %v4339_v43 = vld [vmem:[%s4584_s30 + $0x44] sm:$0xf]  ;;  %v3640_v6 = vor.u32 %v4341_v22, %v3639_v11 }
 0x236   : > { %2022 = vmatpush.bf16.msra.mxu0 %v3672_v1  ;;  %v3641_v45 = vld [vmem:[%s4584_s30 + $0x50] sm:$0xf0]  ;;  %v4371_v55 = vld [vmem:[%s4584_s30 + $0x144] sm:$0xf]  ;;  %v3768_v27 = vor.u32 %v4373_v50, %v3767_v58  ;;  %v3623_v7 = vld [vmem:[%s4584_s30 + $0x20] sm:$0xf] }
 0x237   : > { %2035 = vmatpush.bf16.msra.mxu1 %v3800_v30  ;;  %2048 = vmatpush.bf16.msra.mxu2 %v3676_v42  ;;  %v3769_v54 = vld [vmem:[%s4584_s30 + $0x150] sm:$0xf0]  ;;  %v3644_v4 = vor.u32 %v4339_v43, %v3641_v45  ;;  %v4337_v28 = vld [vmem:[%s4584_s30 + $0x2c] sm:$0xf0]  ;;  %v3751_v12 = vld [vmem:[%s4584_s30 + $0x120] sm:$0xf] }
 0x238   : > { %2061 = vmatpush.bf16.msra.mxu3 %v3804_v51  ;;  %v3772_v16 = vor.u32 %v4371_v55, %v3769_v54  ;;  %v4369_v44 = vld [vmem:[%s4584_s30 + $0x12c] sm:$0xf0]  ;;  %v4335_v52 = vld [vmem:[%s4584_s30 + $0x24] sm:$0xf]  ;;  %v3625_v2 = vld [vmem:[%s4584_s30 + $0x30] sm:$0xf0]  ;;  %v3624_v26 = vor.u32 %v4337_v28, %v3623_v7 }
 0x239   : > { %v4367_v9 = vld [vmem:[%s4584_s30 + $0x124] sm:$0xf]  ;;  %v3753_v0 = vld [vmem:[%s4584_s30 + $0x130] sm:$0xf0]  ;;  %v3607_v17 = vld [vmem:[%s4584_s30] sm:$0xf]  ;;  %v3752_v25 = vor.u32 %v4369_v44, %v3751_v12  ;;  %v3628_v63 = vor.u32 %v4335_v52, %v3625_v2 }
 0x23a   : > { %2023 = vmatpush.bf16.msra.mxu0 %v3656_v15  ;;  %v4333_v18 = vld [vmem:[%s4584_s30 + $0xc] sm:$0xf0]  ;;  %v3735_v14 = vld [vmem:[%s4584_s30 + $0x100] sm:$0xf]  ;;  %v4331_v29 = vld [vmem:[%s4584_s30 + $0x4] sm:$0xf]  ;;  %v3756_v31 = vor.u32 %v4367_v9, %v3753_v0 }
 0x23b   : > { %2036 = vmatpush.bf16.msra.mxu1 %v3784_v62  ;;  %2049 = vmatpush.bf16.msra.mxu2 %v3660_v8  ;;  %v4365_v23 = vld [vmem:[%s4584_s30 + $0x10c] sm:$0xf0]  ;;  %v3609_v24 = vld [vmem:[%s4584_s30 + $0x10] sm:$0xf0]  ;;  %v4363_v33 = vld [vmem:[%s4584_s30 + $0x104] sm:$0xf]  ;;  %v3608_v34 = vor.u32 %v4333_v18, %v3607_v17 }
 0x23c   : > { %2062 = vmatpush.bf16.msra.mxu3 %v3788_v5  ;;  %v3737_v41 = vld [vmem:[%s4584_s30 + $0x110] sm:$0xf0]  ;;  %v3727_v21 = vld [vmem:[%s4584_s30 + $0xe8] sm:$0xf]  ;;  %v4362_v10 = vld [vmem:[%s4584_s30 + $0xf4] sm:$0xf0]  ;;  %v3736_v38 = vor.u32 %v4365_v23, %v3735_v14  ;;  %v3612_v40 = vor.u32 %v4331_v29, %v3609_v24 }
 0x23d   : > { %v3855_v37 = vld [vmem:[%s4584_s30 + $0x1e8] sm:$0xf]  ;;  %v4394_v39 = vld [vmem:[%s4584_s30 + $0x1f4] sm:$0xf0]  ;;  %s3602_s12 = sshll.u32 %s4576_s25, 3  ;;  %v3740_v48 = vor.u32 %v4363_v33, %v3737_v41  ;;  %v3728_v20 = vor.u32 %v4362_v10, %v3727_v21  ;;  %p3861_p5 = scmp.ne.s32.totalorder %s4576_s25, 8 }
 0x23e   : > { %2024 = vmatpush.bf16.msra.mxu0 %v3640_v6  ;;  %v4360_v19 = vld [vmem:[%s4584_s30 + $0xec] sm:$0xf]  ;;  %v3729_v53 = vld [vmem:[%s4584_s30 + $0xf8] sm:$0xf0]  ;;  %s1622_s13 = sshra.s32 %s3602_s12, 3  ;;  %v3856_v49 = vor.u32 %v4394_v39, %v3855_v37 }
 0x23f   : > { %2037 = vmatpush.bf16.msra.mxu1 %v3768_v27  ;;  %2050 = vmatpush.bf16.msra.mxu2 %v3644_v4  ;;  %v4392_v36 = vld [vmem:[%s4584_s30 + $0x1ec] sm:$0xf]  ;;  %v3857_v61 = vld [vmem:[%s4584_s30 + $0x1f8] sm:$0xf0]  ;;  %s4330_s14 = sshll.u32 %s1622_s13, 4  ;;  %v3732_v1 = vor.u32 %v4360_v19, %v3729_v53 }
 0x240   : > { %2063 = vmatpush.bf16.msra.mxu3 %v3772_v16  ;;  %v3711_v46 = vld [vmem:[%s4584_s30 + $0xc8] sm:$0xf]  ;;  %v4358_v35 = vld [vmem:[%s4584_s30 + $0xd4] sm:$0xf0]  ;;  %s1626_s15 = scalar_lea.vmem [#allocation2], %s4330_s14  ;;  %v3860_v13 = vor.u32 %v4392_v36, %v3857_v61 }
 0x241   : > { %v3839_v30 = vld [vmem:[%s4584_s30 + $0x1c8] sm:$0xf]  ;;  %v1627_v42 = vld [vmem:[%s1626_s15] sm:$0xff]  ;;  %v4390_v59 = vld [vmem:[%s4584_s30 + $0x1d4] sm:$0xf0]  ;;  %v3712_v15 = vor.u32 %v4358_v35, %v3711_v46 }
 0x242   : > { %2025 = vmatpush.bf16.msra.mxu0 %v3624_v26  ;;  %v1628_v56 = vld [vmem:[%s1626_s15 + $0x8] sm:$0xff]  ;;  %v3713_v47 = vld [vmem:[%s4584_s30 + $0xd8] sm:$0xf0]  ;;  %v5677_v32 = vpack.c.bf16 %v1627_v42, %v1627_v42  ;;  %v3840_v62 = vor.u32 %v4390_v59, %v3839_v30  ;;  %v4354_v22 = vld [vmem:[%s4584_s30 + $0xb4] sm:$0xf0] }
 0x243   : > { %2038 = vmatpush.bf16.msra.mxu1 %v3752_v25  ;;  %2051 = vmatpush.bf16.msra.mxu2 %v3628_v63  ;;  %v4356_v51 = vld [vmem:[%s4584_s30 + $0xcc] sm:$0xf]  ;;  %v3841_v57 = vld [vmem:[%s4584_s30 + $0x1d8] sm:$0xf0]  ;;  %v5681_v3 = vpack.c.bf16 %v1628_v56, %v1628_v56  ;;  %v3695_v11 = vld [vmem:[%s4584_s30 + $0xa8] sm:$0xf] }
 0x244   : > { %2064 = vmatpush.bf16.msra.mxu3 %v3756_v31  ;;  %v4388_v60 = vld [vmem:[%s4584_s30 + $0x1cc] sm:$0xf]  ;;  %v3716_v8 = vor.u32 %v4356_v51, %v3713_v47  ;;  %v3823_v58 = vld [vmem:[%s4584_s30 + $0x1a8] sm:$0xf]  ;;  %v4386_v50 = vld [vmem:[%s4584_s30 + $0x1b4] sm:$0xf0]  ;;  %v3696_v6 = vor.u32 %v4354_v22, %v3695_v11 }
 0x245   : > { %v3844_v5 = vor.u32 %v4388_v60, %v3841_v57  ;;  %v4352_v43 = vld [vmem:[%s4584_s30 + $0xac] sm:$0xf]  ;;  %v3697_v45 = vld [vmem:[%s4584_s30 + $0xb8] sm:$0xf0]  ;;  %v3824_v27 = vor.u32 %v4386_v50, %v3823_v58  ;;  %v3679_v7 = vld [vmem:[%s4584_s30 + $0x88] sm:$0xf] }
 0x246   : > { %2026 = vmatpush.bf16.msra.mxu0 %v3608_v34  ;;  %v4384_v55 = vld [vmem:[%s4584_s30 + $0x1ac] sm:$0xf]  ;;  %v3825_v54 = vld [vmem:[%s4584_s30 + $0x1b8] sm:$0xf0]  ;;  %v3700_v4 = vor.u32 %v4352_v43, %v3697_v45  ;;  %v4350_v28 = vld [vmem:[%s4584_s30 + $0x94] sm:$0xf0] }
 0x247   : > { %2039 = vmatpush.bf16.msra.mxu1 %v3736_v38  ;;  %2052 = vmatpush.bf16.msra.mxu2 %v3612_v40  ;;  %v3807_v12 = vld [vmem:[%s4584_s30 + $0x188] sm:$0xf]  ;;  %v3828_v16 = vor.u32 %v4384_v55, %v3825_v54  ;;  %v4382_v44 = vld [vmem:[%s4584_s30 + $0x194] sm:$0xf0]  ;;  %v4348_v52 = vld [vmem:[%s4584_s30 + $0x8c] sm:$0xf]  ;;  %v3680_v17 = vor.u32 %v4350_v28, %v3679_v7 }
 0x248   : > { %2065 = vmatpush.bf16.msra.mxu3 %v3740_v48  ;;  %v3681_v2 = vld [vmem:[%s4584_s30 + $0x98] sm:$0xf0]  ;;  %v4380_v9 = vld [vmem:[%s4584_s30 + $0x18c] sm:$0xf]  ;;  %v3808_v26 = vor.u32 %v4382_v44, %v3807_v12  ;;  %v3663_v14 = vld [vmem:[%s4584_s30 + $0x68] sm:$0xf] }
 0x249   : > { %2027 = vmatmul.bf16.vlgmr.msra.gmra.mxu0 %v5677_v32  ;;  %v3809_v0 = vld [vmem:[%s4584_s30 + $0x198] sm:$0xf0]  ;;  %v3684_v18 = vor.u32 %v4348_v52, %v3681_v2  ;;  %v4346_v23 = vld [vmem:[%s4584_s30 + $0x74] sm:$0xf0]  ;;  %v3791_v25 = vld [vmem:[%s4584_s30 + $0x168] sm:$0xf] }
 0x24a   : > { %2071 = vmatpush.bf16.msrb.mxu0 %v3728_v20  ;;  %2053 = vmatmul.bf16.vlgmr.msra.gmra.mxu2 %v5677_v32  ;;  %v3812_v63 = vor.u32 %v4380_v9, %v3809_v0  ;;  %v4378_v29 = vld [vmem:[%s4584_s30 + $0x174] sm:$0xf0]  ;;  %v4344_v24 = vld [vmem:[%s4584_s30 + $0x6c] sm:$0xf]  ;;  %v3665_v33 = vld [vmem:[%s4584_s30 + $0x78] sm:$0xf0]  ;;  %v3664_v21 = vor.u32 %v4346_v23, %v3663_v14 }
 0x24b   : > { %2084 = vmatpush.bf16.msrb.mxu1 %v3856_v49  ;;  %2097 = vmatpush.bf16.msrb.mxu2 %v3732_v1  ;;  %v4376_v31 = vld [vmem:[%s4584_s30 + $0x16c] sm:$0xf]  ;;  %v3793_v41 = vld [vmem:[%s4584_s30 + $0x178] sm:$0xf0]  ;;  %v3792_v10 = vor.u32 %v4378_v29, %v3791_v25  ;;  %v3668_v37 = vor.u32 %v4344_v24, %v3665_v33  ;;  %v3647_v39 = vld [vmem:[%s4584_s30 + $0x48] sm:$0xf] }
 0x24c   : > { %2110 = vmatpush.bf16.msrb.mxu3 %v3860_v13  ;;  %2040 = vmatmul.bf16.vlgmr.msra.gmra.mxu1 %v5681_v3  ;;  %v4342_v34 = vld [vmem:[%s4584_s30 + $0x54] sm:$0xf0]  ;;  %v3775_v19 = vld [vmem:[%s4584_s30 + $0x148] sm:$0xf]  ;;  %v3796_v53 = vor.u32 %v4376_v31, %v3793_v41  ;;  %v4340_v40 = vld [vmem:[%s4584_s30 + $0x4c] sm:$0xf] }
 0x24d   : > { %2066 = vmatmul.bf16.vlgmr.msra.gmra.mxu3 %v5681_v3  ;;  %v4374_v38 = vld [vmem:[%s4584_s30 + $0x154] sm:$0xf0]  ;;  %v3649_v36 = vld [vmem:[%s4584_s30 + $0x58] sm:$0xf0]  ;;  %v4372_v61 = vld [vmem:[%s4584_s30 + $0x14c] sm:$0xf]  ;;  %v3648_v20 = vor.u32 %v4342_v34, %v3647_v39 }
 0x24e   : > { %2072 = vmatpush.bf16.msrb.mxu0 %v3712_v15  ;;  %v3777_v48 = vld [vmem:[%s4584_s30 + $0x158] sm:$0xf0]  ;;  %v3776_v46 = vor.u32 %v4374_v38, %v3775_v19  ;;  %v3652_v35 = vor.u32 %v4340_v40, %v3649_v36  ;;  %v3631_v49 = vld [vmem:[%s4584_s30 + $0x28] sm:$0xf]  ;;  %v4338_v1 = vld [vmem:[%s4584_s30 + $0x34] sm:$0xf0] }
 0x24f   : > { %2085 = vmatpush.bf16.msrb.mxu1 %v3840_v62  ;;  %2098 = vmatpush.bf16.msrb.mxu2 %v3716_v8  ;;  %v3759_v30 = vld [vmem:[%s4584_s30 + $0x128] sm:$0xf]  ;;  %v3780_v42 = vor.u32 %v4372_v61, %v3777_v48  ;;  %v4370_v56 = vld [vmem:[%s4584_s30 + $0x134] sm:$0xf0]  ;;  %v4336_v13 = vld [vmem:[%s4584_s30 + $0x2c] sm:$0xf]  ;;  %v3632_v60 = vor.u32 %v4338_v1, %v3631_v49 }
 0x250   : > { %2111 = vmatpush.bf16.msrb.mxu3 %v3844_v5  ;;  %v3633_v59 = vld [vmem:[%s4584_s30 + $0x38] sm:$0xf0]  ;;  %v4368_v51 = vld [vmem:[%s4584_s30 + $0x12c] sm:$0xf]  ;;  %v3760_v57 = vor.u32 %v4370_v56, %v3759_v30  ;;  %v3615_v62 = vld [vmem:[%s4584_s30 + $0x8] sm:$0xf] }
 0x251   : > { %v3761_v47 = vld [vmem:[%s4584_s30 + $0x138] sm:$0xf0]  ;;  %v3636_v15 = vor.u32 %v4336_v13, %v3633_v59  ;;  %v4334_v8 = vld [vmem:[%s4584_s30 + $0x14] sm:$0xf0]  ;;  %v3743_v11 = vld [vmem:[%s4584_s30 + $0x108] sm:$0xf] }
 0x252   : > { %2073 = vmatpush.bf16.msrb.mxu0 %v3696_v6  ;;  %v3764_v22 = vor.u32 %v4368_v51, %v3761_v47  ;;  %v4366_v58 = vld [vmem:[%s4584_s30 + $0x114] sm:$0xf0]  ;;  %v4332_v5 = vld [vmem:[%s4584_s30 + $0xc] sm:$0xf]  ;;  %v3617_v50 = vld [vmem:[%s4584_s30 + $0x18] sm:$0xf0]  ;;  %v3616_v55 = vor.u32 %v4334_v8, %v3615_v62 }
 0x253   : > { %2086 = vmatpush.bf16.msrb.mxu1 %v3824_v27  ;;  %2099 = vmatpush.bf16.msrb.mxu2 %v3700_v4  ;;  %v4364_v43 = vld [vmem:[%s4584_s30 + $0x10c] sm:$0xf]  ;;  %v3745_v45 = vld [vmem:[%s4584_s30 + $0x118] sm:$0xf0]  ;;  %v3744_v54 = vor.u32 %v4366_v58, %v3743_v11  ;;  %v3620_v6 = vor.u32 %v4332_v5, %v3617_v50  ;;  %v1631_v7 = vld [vmem:[#allocation3 + $0x10] sm:$0xff] }
 0x254   : > { %2112 = vmatpush.bf16.msrb.mxu3 %v3828_v16  ;;  %v3748_v27 = vor.u32 %v4364_v43, %v3745_v45  ;;  %v1632_v52 = vld [vmem:[#allocation3] sm:$0xff]  ;;  %v1634_v24 = vld [vmem:[#allocation3 + $0x8] sm:$0xff] }
 0x256   : > { %2074 = vmatpush.bf16.msrb.mxu0 %v3680_v17 }
 0x257   : > { %2087 = vmatpush.bf16.msrb.mxu1 %v3808_v26  ;;  %2100 = vmatpush.bf16.msrb.mxu2 %v3684_v18 }
 0x258   : > { %2113 = vmatpush.bf16.msrb.mxu3 %v3812_v63 }
 0x25a   : > { %2075 = vmatpush.bf16.msrb.mxu0 %v3664_v21 }
 0x25b   : > { %2088 = vmatpush.bf16.msrb.mxu1 %v3792_v10  ;;  %2101 = vmatpush.bf16.msrb.mxu2 %v3668_v37 }
 0x25c   : > { %2114 = vmatpush.bf16.msrb.mxu3 %v3796_v53 }
 0x25e   : > { %2076 = vmatpush.bf16.msrb.mxu0 %v3648_v20 }
 0x25f   : > { %2089 = vmatpush.bf16.msrb.mxu1 %v3776_v46  ;;  %2102 = vmatpush.bf16.msrb.mxu2 %v3652_v35 }
 0x260   : > { %2115 = vmatpush.bf16.msrb.mxu3 %v3780_v42 }
 0x262   : > { %2077 = vmatpush.bf16.msrb.mxu0 %v3632_v60 }
 0x263   : > { %2090 = vmatpush.bf16.msrb.mxu1 %v3760_v57  ;;  %2103 = vmatpush.bf16.msrb.mxu2 %v3636_v15 }
 0x264   : > { %2116 = vmatpush.bf16.msrb.mxu3 %v3764_v22 }
 0x266   : > { %2078 = vmatpush.bf16.msrb.mxu0 %v3616_v55 }
 0x267   : > { %2091 = vmatpush.bf16.msrb.mxu1 %v3744_v54  ;;  %2104 = vmatpush.bf16.msrb.mxu2 %v3620_v6 }
 0x268   : > { %2117 = vmatpush.bf16.msrb.mxu3 %v3748_v27 }
 0x269   : > { %2079 = vmatmul.bf16.vlgmr.msrb.gmra.mxu0 %v5677_v32 }
 0x26a   : > { %2092 = vmatmul.bf16.vlgmr.msrb.gmra.mxu1 %v5681_v3  ;;  %2105 = vmatmul.bf16.vlgmr.msrb.gmra.mxu2 %v5677_v32  ;;  %v1633_v32 = vld [vmem:[#allocation3 + $0x18] sm:$0xff] }
 0x26b   : > { %2118 = vmatmul.bf16.vlgmr.msrb.gmra.mxu3 %v5681_v3 }
 0x2c6   : > { %v2028_v4 = vpop.f32.mrf.mxu0 }
 0x2c9   : > { %v2041_v28 = vpop.f32.mrf.mxu1 }
 0x2ca   : > { %v2042_v12 = vadd.f32 %v2041_v28, %v2028_v4 }
 0x2cc   : > { %v2123_v16 = vadd.f32 %v2042_v12, %v1631_v7 }
 0x2cd   : > { %v2054_v44 = vpop.f32.mrf.mxu2 }
 0x2ce   : > { %2127 = vst [vmem:[#allocation3 + $0x10] sm:$0xff] %v2123_v16  ;;  %v2030_v0 = vpop.f32.mrf.mxu0 }
 0x2d0   : > { %v2067_v2 = vpop.f32.mrf.mxu3 }
 0x2d1   : > { %v2068_v9 = vadd.f32 %v2067_v2, %v2054_v44  ;;  %v2043_v26 = vpop.f32.mrf.mxu1 }
 0x2d3   : > { %v2124_v17 = vadd.f32 %v2068_v9, %v1632_v52 }
 0x2d5   : > { %2128 = vst [vmem:[#allocation3] sm:$0xff] %v2124_v17  ;;  %v2056_v18 = vpop.f32.mrf.mxu2 }
 0x2d8   : > { %v2069_v14 = vpop.f32.mrf.mxu3 }
 0x2e6   : > { %v2080_v23 = vpop.f32.mrf.mxu0 }
 0x2e7   : > { %v2093_v25 = vpop.f32.mrf.mxu1 }
 0x2e8   : > { %v2094_v3 = vadd.f32 %v2093_v25, %v2080_v23 }
 0x2ea   : > { %v2125_v63 = vadd.f32 %v2094_v3, %v1633_v32 }
 0x2ec   : > { %2129 = vst [vmem:[#allocation3 + $0x18] sm:$0xff] %v2125_v63 }
 0x2ed   : > { %v2106_v29 = vpop.f32.mrf.mxu2 }
 0x2ee   : > { %v2119_v33 = vpop.f32.mrf.mxu3  ;;  %v2082_v31 = vpop.f32.mrf.mxu0 }
 0x2ef   : > { %v2120_v41 = vadd.f32 %v2119_v33, %v2106_v29  ;;  %v2095_v21 = vpop.f32.mrf.mxu1 }
 0x2f1   : > { %v2126_v10 = vadd.f32 %v2120_v41, %v1634_v24 }
 0x2f2   : > { %2134 = sbr.rel (%p3861_p5) target bundleno = 1512 (0x5e8), region = 56 }
 0x2f3   : > { %2130 = vst [vmem:[#allocation3 + $0x8] sm:$0xff] %v2126_v10 }
 0x2f5   : > { %v2108_v37 = vpop.f32.mrf.mxu2 }
 0x2f6   : > { %v2121_v39 = vpop.f32.mrf.mxu3 }
 0x2f7   : > { %v4402_v34 = vld [vmem:[%s6050_s5 + $0x38] sm:$0xff]  ;;  %v4401_v40 = vld [vmem:[%s6050_s5 + $0x30] sm:$0xff]  ;;  %v4400_v20 = vld [vmem:[%s6050_s5 + $0x28] sm:$0xff]  ;;  %vm2921_vm3 = vcmask 1043456   ;;  %vm2917_vm4 = vcmask 195584   ;;  %vm3087_vm5 = vcmask 31744  }
 0x2f8   : > { %v4410_v19 = vld [vmem:[%s6050_s5 + $0x78] sm:$0xff]  ;;  %2421 = vmatpush.bf16.msra.mxu0 %v4402_v34  ;;  %v4409_v36 = vld [vmem:[%s6050_s5 + $0x70] sm:$0xff]  ;;  %v4408_v46 = vld [vmem:[%s6050_s5 + $0x68] sm:$0xff] }
 0x2f9   : > { %v4418_v53 = vld [vmem:[%s6050_s5 + $0xb8] sm:$0xff]  ;;  %2434 = vmatpush.bf16.msra.mxu1 %v4410_v19  ;;  %v4417_v61 = vld [vmem:[%s6050_s5 + $0xb0] sm:$0xff]  ;;  %v4416_v35 = vld [vmem:[%s6050_s5 + $0xa8] sm:$0xff] }
 0x2fa   : > { %v4426_v38 = vld [vmem:[%s6050_s5 + $0xf8] sm:$0xff]  ;;  %2447 = vmatpush.bf16.msra.mxu2 %v4418_v53  ;;  %v4425_v48 = vld [vmem:[%s6050_s5 + $0xf0] sm:$0xff]  ;;  %v4424_v49 = vld [vmem:[%s6050_s5 + $0xe8] sm:$0xff] }
 0x2fb   : > { %2460 = vmatpush.bf16.msra.mxu3 %v4426_v38  ;;  %v4399_v1 = vld [vmem:[%s6050_s5 + $0x20] sm:$0xff]  ;;  %v4398_v13 = vld [vmem:[%s6050_s5 + $0x18] sm:$0xff]  ;;  %v4397_v57 = vld [vmem:[%s6050_s5 + $0x10] sm:$0xff] }
 0x2fc   : > { %2422 = vmatpush.bf16.msra.mxu0 %v4401_v40  ;;  %v4407_v30 = vld [vmem:[%s6050_s5 + $0x60] sm:$0xff]  ;;  %v4406_v59 = vld [vmem:[%s6050_s5 + $0x58] sm:$0xff]  ;;  %v4405_v15 = vld [vmem:[%s6050_s5 + $0x50] sm:$0xff] }
 0x2fd   : > { %2435 = vmatpush.bf16.msra.mxu1 %v4409_v36  ;;  %v4415_v42 = vld [vmem:[%s6050_s5 + $0xa0] sm:$0xff]  ;;  %v4414_v51 = vld [vmem:[%s6050_s5 + $0x98] sm:$0xff]  ;;  %v4413_v62 = vld [vmem:[%s6050_s5 + $0x90] sm:$0xff] }
 0x2fe   : > { %2448 = vmatpush.bf16.msra.mxu2 %v4417_v61  ;;  %v4423_v56 = vld [vmem:[%s6050_s5 + $0xe0] sm:$0xff]  ;;  %v4422_v47 = vld [vmem:[%s6050_s5 + $0xd8] sm:$0xff]  ;;  %v4421_v8 = vld [vmem:[%s6050_s5 + $0xd0] sm:$0xff] }
 0x2ff   : > { %2461 = vmatpush.bf16.msra.mxu3 %v4425_v48  ;;  %v2139_v60 = vld [vmem:[%s6051_s6 + $0x5] sm:$0xf]  ;;  %v2138_v50 = vld [vmem:[#allocation3 + $0x8] sm:$0xff]  ;;  %v2136_v55 = vld [vmem:[#allocation3] sm:$0xff] }
 0x300   : > { %2423 = vmatpush.bf16.msra.mxu0 %v4400_v20  ;;  %v2143_v11 = vperm.slane %v2139_v60, 2  ;;  %v2141_v22 = vperm.slane %v2139_v60, 0  ;;  %v2137_v58 = vld [vmem:[#allocation3 + $0x18] sm:$0xff]  ;;  %v2135_v5 = vld [vmem:[#allocation3 + $0x10] sm:$0xff]  ;;  %v2144_v43 = vperm.slane %v2139_v60, 3  ;;  %v2142_v45 = vperm.slane %v2139_v60, 1 }
 0x301   : > { %2436 = vmatpush.bf16.msra.mxu1 %v4408_v46  ;;  %v4396_v54 = vld [vmem:[%s6050_s5 + $0x8] sm:$0xff]  ;;  %v4395_v44 = vld [vmem:[%s6050_s5] sm:$0xff]  ;;  %v4434_v14 = vld [vmem:[%s6050_s5 + $0x138] sm:$0xff] }
 0x302   : > { %2449 = vmatpush.bf16.msra.mxu2 %v4416_v35  ;;  %v4404_v6 = vld [vmem:[%s6050_s5 + $0x48] sm:$0xff]  ;;  %v2151_v27 = vadd.f32 %v2143_v11, %v2137_v58  ;;  %v2149_v4 = vadd.f32 %v2141_v22, %v2135_v5  ;;  %v2152_v12 = vadd.f32 %v2144_v43, %v2138_v50  ;;  %v2150_v16 = vadd.f32 %v2142_v45, %v2136_v55  ;;  %v4403_v52 = vld [vmem:[%s6050_s5 + $0x40] sm:$0xff]  ;;  %v4442_v23 = vld [vmem:[%s6050_s5 + $0x178] sm:$0xff] }
 0x303   : > { %2462 = vmatpush.bf16.msra.mxu3 %v4424_v49  ;;  %v4412_v7 = vld [vmem:[%s6050_s5 + $0x88] sm:$0xff]  ;;  %v4411_v0 = vld [vmem:[%s6050_s5 + $0x80] sm:$0xff]  ;;  %v4450_v32 = vld [vmem:[%s6050_s5 + $0x1b8] sm:$0xff] }
 0x304   : > { %2424 = vmatpush.bf16.msra.mxu0 %v4399_v1  ;;  %v4420_v28 = vld [vmem:[%s6050_s5 + $0xc8] sm:$0xff]  ;;  %v2155_v2 = vmax.f32 %v2151_v27, 0.0  ;;  %v2153_v9 = vmax.f32 %v2149_v4, 0.0  ;;  %v4419_v17 = vld [vmem:[%s6050_s5 + $0xc0] sm:$0xff]  ;;  %v2156_v26 = vmax.f32 %v2152_v12, 0.0  ;;  %v2154_v18 = vmax.f32 %v2150_v16, 0.0 }
 0x305   : > { %2437 = vmatpush.bf16.msra.mxu1 %v4407_v30  ;;  %v4458_v25 = vld [vmem:[%s6050_s5 + $0x1f8] sm:$0xff]  ;;  %v4433_v33 = vld [vmem:[%s6050_s5 + $0x130] sm:$0xff]  ;;  %v4432_v10 = vld [vmem:[%s6050_s5 + $0x128] sm:$0xff] }
 0x306   : > { %2450 = vmatpush.bf16.msra.mxu2 %v4415_v42  ;;  %v2159_v3 = vpack.c.bf16 %v2155_v2, %v2155_v2  ;;  %v2157_v63 = vpack.c.bf16 %v2153_v9, %v2153_v9  ;;  %v2160_v29 = vpack.c.bf16 %v2156_v26, %v2156_v26  ;;  %v2158_v24 = vpack.c.bf16 %v2154_v18, %v2154_v18  ;;  %v4441_v31 = vld [vmem:[%s6050_s5 + $0x170] sm:$0xff]  ;;  %v4440_v37 = vld [vmem:[%s6050_s5 + $0x168] sm:$0xff]  ;;  %v4431_v19 = vld [vmem:[%s6050_s5 + $0x120] sm:$0xff] }
 0x307   : > { %2463 = vmatpush.bf16.msra.mxu3 %v4423_v56  ;;  %v4449_v41 = vld [vmem:[%s6050_s5 + $0x1b0] sm:$0xff]  ;;  %v4448_v39 = vld [vmem:[%s6050_s5 + $0x1a8] sm:$0xff]  ;;  %v4439_v53 = vld [vmem:[%s6050_s5 + $0x160] sm:$0xff] }
 0x308   : > { %2425 = vmatpush.bf16.msra.mxu0 %v4398_v13  ;;  %v4457_v21 = vld [vmem:[%s6050_s5 + $0x1f0] sm:$0xff]  ;;  %v4456_v34 = vld [vmem:[%s6050_s5 + $0x1e8] sm:$0xff]  ;;  %v4447_v38 = vld [vmem:[%s6050_s5 + $0x1a0] sm:$0xff] }
 0x309   : > { %2438 = vmatpush.bf16.msra.mxu1 %v4406_v59  ;;  %v4455_v40 = vld [vmem:[%s6050_s5 + $0x1e0] sm:$0xff]  ;;  %v4430_v36 = vld [vmem:[%s6050_s5 + $0x118] sm:$0xff]  ;;  %v4429_v46 = vld [vmem:[%s6050_s5 + $0x110] sm:$0xff] }
 0x30a   : > { %2451 = vmatpush.bf16.msra.mxu2 %v4414_v51  ;;  %v4438_v61 = vld [vmem:[%s6050_s5 + $0x158] sm:$0xff]  ;;  %v4437_v35 = vld [vmem:[%s6050_s5 + $0x150] sm:$0xff]  ;;  %v4428_v30 = vld [vmem:[%s6050_s5 + $0x108] sm:$0xff] }
 0x30b   : > { %2464 = vmatpush.bf16.msra.mxu3 %v4422_v47  ;;  %v4446_v48 = vld [vmem:[%s6050_s5 + $0x198] sm:$0xff]  ;;  %v4445_v49 = vld [vmem:[%s6050_s5 + $0x190] sm:$0xff]  ;;  %v4436_v42 = vld [vmem:[%s6050_s5 + $0x148] sm:$0xff] }
 0x30c   : > { %2426 = vmatpush.bf16.msra.mxu0 %v4397_v57  ;;  %v4454_v20 = vld [vmem:[%s6050_s5 + $0x1d8] sm:$0xff]  ;;  %v4453_v1 = vld [vmem:[%s6050_s5 + $0x1d0] sm:$0xff]  ;;  %v2474_v56 = vld [vmem:[%s6046_s1] sm:$0xff] }
 0x30d   : > { %2439 = vmatpush.bf16.msra.mxu1 %v4405_v15  ;;  %v4444_v13 = vld [vmem:[%s6050_s5 + $0x188] sm:$0xff]  ;;  %v2546_v47 = vunpack.c.l.b16 %v2474_v56  ;;  %v2547_v60 = vunpack.c.h.b16 %v2474_v56  ;;  %v4427_v57 = vld [vmem:[%s6050_s5 + $0x100] sm:$0xff]  ;;  %v4466_v45 = vld [vmem:[%s6050_s5 + $0x238] sm:$0xff] }
 0x30e   : > { %2452 = vmatpush.bf16.msra.mxu2 %v4413_v62  ;;  %v4452_v59 = vld [vmem:[%s6050_s5 + $0x1c8] sm:$0xff]  ;;  %v4435_v15 = vld [vmem:[%s6050_s5 + $0x140] sm:$0xff]  ;;  %v4465_v55 = vld [vmem:[%s6050_s5 + $0x230] sm:$0xff] }
 0x30f   : > { %2465 = vmatpush.bf16.msra.mxu3 %v4421_v8  ;;  %v2475_v51 = vld [vmem:[%s6046_s1 + $0x8] sm:$0xff]  ;;  %v4443_v11 = vld [vmem:[%s6050_s5 + $0x180] sm:$0xff]  ;;  %v2550_v58 = vpack.c.b16 %v2546_v47, %v2546_v47  ;;  %v2551_v5 = vpack.c.b16 %v2547_v60, %v2547_v60  ;;  %v4462_v27 = vld [vmem:[%s6050_s5 + $0x218] sm:$0xff] }
 0x310   : > { %2427 = vmatpush.bf16.msra.mxu0 %v4396_v54  ;;  %v2548_v62 = vunpack.c.l.b16 %v2475_v51  ;;  %v2549_v8 = vunpack.c.h.b16 %v2475_v51  ;;  %v4451_v22 = vld [vmem:[%s6050_s5 + $0x1c0] sm:$0xff]  ;;  %v4464_v54 = vld [vmem:[%s6050_s5 + $0x228] sm:$0xff]  ;;  %v4474_v26 = vld [vmem:[%s6050_s5 + $0x278] sm:$0xff] }
 0x311   : > { %2440 = vmatpush.bf16.msra.mxu1 %v4404_v6  ;;  %v4463_v6 = vld [vmem:[%s6050_s5 + $0x220] sm:$0xff]  ;;  %v4460_v16 = vld [vmem:[%s6050_s5 + $0x208] sm:$0xff]  ;;  %v4473_v18 = vld [vmem:[%s6050_s5 + $0x270] sm:$0xff] }
 0x312   : > { %2453 = vmatpush.bf16.msra.mxu2 %v4412_v7  ;;  %v2552_v50 = vpack.c.b16 %v2548_v62, %v2548_v62  ;;  %v2553_v43 = vpack.c.b16 %v2549_v8, %v2549_v8  ;;  %v4459_v9 = vld [vmem:[%s6050_s5 + $0x200] sm:$0xff]  ;;  %v4468_v56 = vld [vmem:[%s6050_s5 + $0x248] sm:$0xff]  ;;  %v2888_v51 = vld [vmem:[%s6046_s1 + $0x10] sm:$0xf] }
 0x313   : > { %2466 = vmatpush.bf16.msra.mxu3 %v4420_v28  ;;  %v4461_v28 = vld [vmem:[%s6050_s5 + $0x210] sm:$0xff]  ;;  %v4483_v47 = vld [vmem:[%s6050_s5 + $0x2c4] sm:$0xff]  ;;  %v4482_v60 = vld [vmem:[%s6050_s5 + $0x2bc] sm:$0xff] }
 0x314   : > { %2428 = vmatpush.bf16.msra.mxu0 %v4395_v44  ;;  %v4514_v62 = vld [vmem:[%s6051_s6 + $0xb] ss:$0 sm:$0xff] }
 0x315   : > { %2441 = vmatpush.bf16.msra.mxu1 %v4403_v52 }
 0x316   : > { %2454 = vmatpush.bf16.msra.mxu2 %v4411_v0 }
 0x317   : > { %2467 = vmatpush.bf16.msra.mxu3 %v4419_v17  ;;  %2429 = vmatmul.bf16.vlgmr.msra.gmra.mxu0 %v2157_v63 }
 0x318   : > { %2750 = vmatpush.bf16.msrb.mxu0 %v4434_v14  ;;  %2442 = vmatmul.bf16.vlgmr.msra.gmra.mxu1 %v2158_v24  ;;  %v2907_v14 = vld [vmem:[%s6050_s5 + $0x288] sm:$0xf]  ;;  %v4471_v24 = vld [vmem:[%s6050_s5 + $0x260] sm:$0xff] }
 0x319   : > { %2763 = vmatpush.bf16.msrb.mxu1 %v4442_v23  ;;  %2455 = vmatmul.bf16.vlgmr.msra.gmra.mxu2 %v2159_v3  ;;  %v2913_v23 = vunpack.c.l.b16 %v2907_v14  ;;  %v4472_v3 = vld [vmem:[%s6050_s5 + $0x268] sm:$0xff] }
 0x31a   : > { %2776 = vmatpush.bf16.msrb.mxu2 %v4450_v32  ;;  %2468 = vmatmul.bf16.vlgmr.msra.gmra.mxu3 %v2160_v29 }
 0x31b   : > { %2789 = vmatpush.bf16.msrb.mxu3 %v4458_v25  ;;  %v2915_v32 = vpack.c.b16 %v2913_v23, %v2913_v23  ;;  %v4512_v25 = vld [vmem:[%s6051_s6 + $0x9] ss:$0 sm:$0xff] }
 0x31c   : > { %2751 = vmatpush.bf16.msrb.mxu0 %v4433_v33  ;;  %v4513_v33 = vld [vmem:[%s6051_s6 + $0xa] ss:$0 sm:$0xff] }
 0x31d   : > { %2764 = vmatpush.bf16.msrb.mxu1 %v4441_v31  ;;  %v2923_v63 = vsel %vm2921_vm3, %v2915_v32, 0 }
 0x31e   : > { %2777 = vmatpush.bf16.msrb.mxu2 %v4449_v41 }
 0x31f   : > { %2790 = vmatpush.bf16.msrb.mxu3 %v4457_v21 }
 0x320   : > { %2752 = vmatpush.bf16.msrb.mxu0 %v4432_v10  ;;  %v4470_v10 = vld [vmem:[%s6050_s5 + $0x258] sm:$0xff] }
 0x321   : > { %2765 = vmatpush.bf16.msrb.mxu1 %v4440_v37 }
 0x322   : > { %2778 = vmatpush.bf16.msrb.mxu2 %v4448_v39 }
 0x323   : > { %2791 = vmatpush.bf16.msrb.mxu3 %v4456_v34 }
 0x324   : > { %2753 = vmatpush.bf16.msrb.mxu0 %v4431_v19  ;;  %v4469_v19 = vld [vmem:[%s6050_s5 + $0x250] sm:$0xff] }
 0x325   : > { %2766 = vmatpush.bf16.msrb.mxu1 %v4439_v53 }
 0x326   : > { %2779 = vmatpush.bf16.msrb.mxu2 %v4447_v38 }
 0x327   : > { %2792 = vmatpush.bf16.msrb.mxu3 %v4455_v40 }
 0x328   : > { %2754 = vmatpush.bf16.msrb.mxu0 %v4430_v36 }
 0x329   : > { %2767 = vmatpush.bf16.msrb.mxu1 %v4438_v61 }
 0x32a   : > { %2780 = vmatpush.bf16.msrb.mxu2 %v4446_v48 }
 0x32b   : > { %2793 = vmatpush.bf16.msrb.mxu3 %v4454_v20 }
 0x32c   : > { %2755 = vmatpush.bf16.msrb.mxu0 %v4429_v46 }
 0x32d   : > { %2768 = vmatpush.bf16.msrb.mxu1 %v4437_v35 }
 0x32e   : > { %2781 = vmatpush.bf16.msrb.mxu2 %v4445_v49 }
 0x32f   : > { %2794 = vmatpush.bf16.msrb.mxu3 %v4453_v1 }
 0x330   : > { %2756 = vmatpush.bf16.msrb.mxu0 %v4428_v30 }
 0x331   : > { %2769 = vmatpush.bf16.msrb.mxu1 %v4436_v42 }
 0x332   : > { %2782 = vmatpush.bf16.msrb.mxu2 %v4444_v13  ;;  %v4475_v13 = vld [vmem:[%s6050_s5 + $0x280] sm:$0xff] }
 0x333   : > { %2795 = vmatpush.bf16.msrb.mxu3 %v4452_v59  ;;  %v4467_v59 = vld [vmem:[%s6050_s5 + $0x240] sm:$0xff] }
 0x334   : > { %2757 = vmatpush.bf16.msrb.mxu0 %v4427_v57  ;;  %v4481_v57 = vld [vmem:[%s6050_s5 + $0x2b4] sm:$0xff] }
 0x335   : > { %2770 = vmatpush.bf16.msrb.mxu1 %v4435_v15  ;;  %v4480_v15 = vld [vmem:[%s6050_s5 + $0x2ac] sm:$0xff] }
 0x336   : > { %2783 = vmatpush.bf16.msrb.mxu2 %v4443_v11 }
 0x337   : > { %2796 = vmatpush.bf16.msrb.mxu3 %v4451_v22  ;;  %2758 = vmatmul.bf16.vlgmr.msrb.gmra.mxu0 %v2550_v58 }
 0x338   : > { %2771 = vmatmul.bf16.vlgmr.msrb.gmra.mxu1 %v2551_v5  ;;  %2873 = vmatpush.bf16.msra.mxu0 %v4466_v45 }
 0x339   : > { %2784 = vmatmul.bf16.vlgmr.msrb.gmra.mxu2 %v2552_v50  ;;  %2931 = vmatpush.bf16.msra.mxu1 %v2923_v63  ;;  %v4479_v50 = vld [vmem:[%s6050_s5 + $0x2a4] sm:$0xff] }
 0x33a   : > { %2797 = vmatmul.bf16.vlgmr.msrb.gmra.mxu3 %v2553_v43  ;;  %2986 = vmatpush.bf16.msra.mxu2 %v4474_v26  ;;  %v4478_v43 = vld [vmem:[%s6050_s5 + $0x29c] sm:$0xff] }
 0x33b   : > { %3074 = vmatpush.bf16.msra.mxu3 %v4483_v47 }
 0x33c   : > { %2874 = vmatpush.bf16.msra.mxu0 %v4465_v55 }
 0x33d   : > { %2932 = vmatpush.bf16.msra.mxu1 %v4475_v13 }
 0x33e   : > { %2987 = vmatpush.bf16.msra.mxu2 %v4473_v18  ;;  %v4529_v18 = vmov 4.0  }
 0x33f   : > { %3075 = vmatpush.bf16.msra.mxu3 %v4482_v60  ;;  %4517 = vrcp.f32 %v4529_v18 }
 0x340   : > { %2875 = vmatpush.bf16.msra.mxu0 %v4464_v54  ;;  %v4477_v54 = vld [vmem:[%s6050_s5 + $0x294] sm:$0xff] }
 0x342   : > { %2988 = vmatpush.bf16.msra.mxu2 %v4472_v3 }
 0x343   : > { %3076 = vmatpush.bf16.msra.mxu3 %v4481_v57 }
 0x344   : > { %2876 = vmatpush.bf16.msra.mxu0 %v4463_v6  ;;  %v4476_v6 = vld [vmem:[%s6050_s5 + $0x28c] sm:$0xff] }
 0x345   : > { %v4518_v14 = vpop.eup %4517 }
 0x346   : > { %2989 = vmatpush.bf16.msra.mxu2 %v4471_v24  ;;  %v3092_v23 = vmul.f32 4.0, %v4518_v14  ;;  %vm3096_vm6 = vweird.f32 %v4518_v14 }
 0x347   : > { %3077 = vmatpush.bf16.msra.mxu3 %v4480_v15 }
 0x348   : > { %2877 = vmatpush.bf16.msra.mxu0 %v4462_v27  ;;  %4154 = vmatmul.msk.bf16.vlgmr.msra.gmra.mxu1 %vm2917_vm4, %v2888_v51  ;;  %v4515_v27 = vld [vmem:[%s6051_s6 + $0xc] ss:$0 sm:$0xff]  ;;  %v3093_v32 = vsub.f32 1.0, %v3092_v23 }
 0x34a   : > { %2990 = vmatpush.bf16.msra.mxu2 %v4470_v10 }
 0x34b   : > { %3078 = vmatpush.bf16.msra.mxu3 %v4479_v50 }
 0x34c   : > { %2878 = vmatpush.bf16.msra.mxu0 %v4461_v28 }
 0x34e   : > { %2991 = vmatpush.bf16.msra.mxu2 %v4469_v19 }
 0x34f   : > { %3079 = vmatpush.bf16.msra.mxu3 %v4478_v43 }
 0x350   : > { %2879 = vmatpush.bf16.msra.mxu0 %v4460_v16 }
 0x352   : > { %2992 = vmatpush.bf16.msra.mxu2 %v4468_v56 }
 0x353   : > { %3080 = vmatpush.bf16.msra.mxu3 %v4477_v54 }
 0x354   : > { %2880 = vmatpush.bf16.msra.mxu0 %v4459_v9 }
 0x356   : > { %2993 = vmatpush.bf16.msra.mxu2 %v4467_v59 }
 0x357   : > { %3081 = vmatpush.bf16.msra.mxu3 %v4476_v6 }
 0x394   : > { %v2430_v4 = vpop.f32.mrf.mxu0 }
 0x395   : > { %v2443_v7 = vpop.f32.mrf.mxu1  ;;  %v2431_v29 = vadd.f32 %v4512_v25, %v2430_v4  ;;  %v3094_v25 = vmul.f32 %v4518_v14, %v3093_v32 }
 0x397   : > { %v2444_v31 = vadd.f32 %v2443_v7, %v2431_v29  ;;  %v3095_v3 = vadd.f32 %v4518_v14, %v3094_v25 }
 0x399   : > { %v3097_v63 = vsel %vm3096_vm6, %v4518_v14, %v3095_v3 }
 0x39c   : > { %v2456_v12 = vpop.f32.mrf.mxu2  ;;  %v2432_v52 = vpop.f32.mrf.mxu0 }
 0x39d   : > { %v2469_v44 = vpop.f32.mrf.mxu3  ;;  %v2445_v2 = vpop.f32.mrf.mxu1  ;;  %v2457_v39 = vadd.f32 %v2456_v12, %v2444_v31  ;;  %v4528_v52 = vmov 4  }
 0x39e   : > { %4511 = vset.pattern.permute.xlu0 %v4528_v52  ;;  %v4516_v2 = vld [vmem:[%s6051_s6 + $0xd] ss:$0 sm:$0xff] }
 0x39f   : > { %v2470_v40 = vadd.f32 %v2469_v44, %v2457_v39 }
 0x3a1   : > { %v2473_v46 = vmax.f32 %v2470_v40, 0.0 }
 0x3a4   : > { %v2458_v0 = vpop.f32.mrf.mxu2 }
 0x3a5   : > { %v2471_v17 = vpop.f32.mrf.mxu3 }
 0x3b4   : > { %v2759_v41 = vpop.f32.mrf.mxu0 }
 0x3b5   : > { %v2772_v21 = vpop.f32.mrf.mxu1  ;;  %v2760_v37 = vadd.f32 %v4513_v33, %v2759_v41 }
 0x3b7   : > { %v2773_v34 = vadd.f32 %v2772_v21, %v2760_v37 }
 0x3bc   : > { %v2785_v53 = vpop.f32.mrf.mxu2  ;;  %v2761_v61 = vpop.f32.mrf.mxu0 }
 0x3bd   : > { %v2798_v38 = vpop.f32.mrf.mxu3  ;;  %v2786_v36 = vadd.f32 %v2785_v53, %v2773_v34  ;;  %v2774_v48 = vpop.f32.mrf.mxu1 }
 0x3bf   : > { %v2799_v20 = vadd.f32 %v2798_v38, %v2786_v36 }
 0x3c1   : > { %v2802_v35 = vmax.f32 %v2799_v20, 0.0 }
 0x3c3   : > { %v2803_v49 = vadd.f32 %v2802_v35, %v2473_v46 }
 0x3c4   : > { %v2787_v1 = vpop.f32.mrf.mxu2 }
 0x3c5   : > { %v2800_v30 = vpop.f32.mrf.mxu3  ;;  %v2804_v42 = vpack.c.bf16 %v2803_v49, %v2803_v49  ;;  %v2934_v45 = vpop.f32.mrf.mxu1 }
 0x3c7   : > { %2881 = vmatmul.bf16.vlgmr.msra.gmra.mxu0 %v2804_v42 }
 0x3cd   : > { %v2936_v55 = vpop.f32.mrf.mxu1 }
 0x444   : > { %v2882_v8 = vpop.f32.mrf.mxu0 }
 0x445   : > { %v2883_v11 = vadd.f32 %v4514_v62, %v2882_v8 }
 0x447   : > { %v2886_v22 = vmax.f32 %v2883_v11, 0.0 }
 0x449   : > { %v2887_v58 = vpack.c.bf16 %v2886_v22, %v2886_v22 }
 0x44b   : > { %2994 = vmatmul.bf16.vlgmr.msra.gmra.mxu2 %v2887_v58 }
 0x44c   : > { %v2884_v5 = vpop.f32.mrf.mxu0 }
 0x4ce   : > { %v2995_v4 = vpop.f32.mrf.mxu2 }
 0x4cf   : > { %v2996_v7 = vadd.f32 %v2995_v4, %v2934_v45 }
 0x4d1   : > { %v3003_v28 = vadd.f32 %v4515_v27, %v2996_v7 }
 0x4d3   : > { %v3004_v12 = vmax.f32 %v3003_v28, 0.0 }
 0x4d5   : > { %v3005_v16 = vpack.c.bf16 %v3004_v12, %v3004_v12 }
 0x4d6   : > { %v2997_v44 = vpop.f32.mrf.mxu2 }
 0x4d7   : > { %3082 = vmatmul.bf16.vlgmr.msra.gmra.mxu3 %v3005_v16 }
 0x55a   : > { %v3083_v9 = vpop.f32.mrf.mxu3 }
 0x55b   : > { %v3084_v0 = vadd.f32 %v4516_v2, %v3083_v9 }
 0x55d   : > { %v3088_v17 = vsel %vm3087_vm5, %v3084_v0, 0.0 }
 0x55e   : > { %3089 = vadd.xlane.f32.xlu0 %v3088_v17 }
 0x562   : > { %v3085_v26 = vpop.f32.mrf.mxu3 }
 0x572   : > { %3102 = vperm.xlu0 %4511, %v3084_v0  }
 0x5d1   : > { %v3090_v29 = vpop.xlane.xlu0 %3089 }
 0x5d2   : > { %v3098_v24 = vmul.f32 %v3097_v63, %v3090_v29 }
 0x5d4   : > { %v3099_v33 = vsub.f32 %v3084_v0, %v3098_v24 }
 0x5e4   : > { %v3103_v31 = vpop.permute.xlu0 %3102 }
 0x5e5   : > { %v3105_v41 = vadd.f32 %v3103_v31, %v3099_v33 }
 0x5e7   : > { %3106 = vst.msk [vmem:[%s6052_s7] sm:$0xff] %vm3087_vm5, %v3105_v41 }
 0x5e8 PF: > { %s17_s24 = sadd.s32 1, %s4525_s24  }
 0x5e9   : > { %p14_p6 = scmp.ge.s32.totalorder %s17_s24, 11  }
 0x5eb   :  { %16 = sbr.rel (!%p14_p6) target bundleno = 1 (0x1), region = 83 }

</bundles_post_ra>
